<compile_context>
chip_gen: v5e
topology: v5e:2x2
jax: 0.10.0
libtpu: 0.0.40
codegen_flags: <defaults>
</compile_context>

<pallas_src>
import functools

import jax
import jax.numpy as jnp
from jax import lax
from jax.experimental import pallas as pl
from jax.experimental.pallas import tpu as pltpu


def _focus_cbl_kernel(*refs, th, W, Cin, K, Kc_pad):
    # refs = (xa_ref, halo_row_refs..., w_ref, aff_ref, o_ref)
    #   xa_ref:   (1, th, Cin, Wp)   main row-block of the padded input (bf16)
    #   halo j:   (1, 1,  Cin, Wp)   padded row (r+1)*th + j   (bf16)
    #   w_ref:    (Cout, Kc_pad)     conv weight, cols ordered (kh, kw, cin) (bf16)
    #   aff_ref:  (Cout, 2)          folded BN: col 0 = scale, col 1 = bias (f32)
    #   o_ref:    (1, Cout, th, W)   output tile, dense NCHW (f32)
    halo = K - 1
    xa_ref = refs[0]
    halo_refs = refs[1:1 + halo]
    w_ref, aff_ref, o_ref = refs[1 + halo:]

    wmat = w_ref[...]                                   # (Cout, Kc_pad), resident
    xa = xa_ref[0]                                      # (th, Cin, Wp)
    # th + halo padded input rows needed by this output row tile.
    rows = [xa[i] for i in range(th)] + [h[0, 0] for h in halo_refs]

    zpad = Kc_pad - K * K * Cin
    zeros_tap = jnp.zeros((zpad, W), xa.dtype) if zpad else None   # hoisted out of loop

    out_rows = []
    for i in range(th):                                 # static unroll over output rows
        # Assemble the (Kc_pad, W) conv operand for output row i: K*K shifted
        # (Cin, W) taps stacked along sublanes, order (kh, kw, cin) == weight cols.
        taps = [rows[i + kh][:, kw:kw + W] for kh in range(K) for kw in range(K)]
        if zeros_tap is not None:
            taps.append(zeros_tap)
        rhs = jnp.concatenate(taps, axis=0)             # (Kc_pad, W)
        acc = jnp.dot(wmat, rhs, preferred_element_type=jnp.float32)   # (Cout, W) f32
        out_rows.append(acc[:, None, :])
    acc = jnp.concatenate(out_rows, axis=1)             # (Cout, th, W) f32

    # Folded BatchNorm (eval) + SiLU; per-channel scale/bias broadcast over (th, W).
    aff = aff_ref[...]
    scale = jnp.expand_dims(aff[:, 0:1], -1)            # (Cout, 1, 1)
    bias = jnp.expand_dims(aff[:, 1:2], -1)
    y = acc * scale + bias
    y = y * jax.nn.sigmoid(y)
    o_ref[0] = y.astype(o_ref.dtype)                    # dense NCHW store, no channel pad


def _round_up(x, m):
    return ((x + m - 1) // m) * m


def _step_vmem_bytes(th, W, Wp, Cin, Cout, Kc_pad, out_bytes):
    """Rough per-grid-step VMEM footprint (double-buffered streams + intermediates)."""
    in_main = th * Cin * Wp * 2
    in_halo = 2 * Cin * Wp * 2
    out_tile = Cout * th * W * out_bytes
    weights = Cout * Kc_pad * 2 + Cout * 2 * 4
    interm = Cout * th * W * 4 + 2 * Kc_pad * W * 2     # f32 acc/y + rhs staging
    return 2 * (in_main + in_halo + out_tile) + weights + interm


def _pick_tile_h(H, W, Wp, Cin, Cout, Kc_pad, target, out_bytes, budget_bytes):
    """Row-tile height: divisor of H, multiple of 8 (or == H; required by the (8,128)
    rule on the NCHW output block), <= target, and fitting the VMEM budget.  The old
    th=H fallback is now budget-checked so it cannot blow v7x's 64 MiB VMEM."""
    cands = [d for d in range(1, H + 1) if H % d == 0 and (d % 8 == 0 or d == H)]
    fits = [d for d in cands
            if _step_vmem_bytes(d, W, Wp, Cin, Cout, Kc_pad, out_bytes) <= budget_bytes]
    pref = [d for d in fits if d <= target]
    if pref:
        return max(pref)
    if fits:
        return min(fits)
    return min(cands)   # pathological H (no multiple-of-8 divisor): smallest legal tile


def focus_forward(x, w, gamma, beta, running_mean, running_var, eps=1e-5,
                  tile_h=32, compute_dtype=jnp.bfloat16, out_dtype=jnp.float32,
                  vmem_budget_bytes=16 * 1024 * 1024):
    """Focus forward.  x: (B, C, Hin, Win) f32 NCHW;  w: (Cout, 4*C, K, K) OIHW.
    Returns (B, Cout, Hin//2, Win//2) NCHW in out_dtype (same layout as PyTorch)."""
    B, C, Hin, Win = x.shape
    Cout, Cin_w, K, _ = w.shape
    Cin = 4 * C
    assert Cin_w == Cin, (Cin_w, Cin)
    assert Hin % 2 == 0 and Win % 2 == 0
    H, W = Hin // 2, Win // 2
    pad = K // 2                       # autopad(3) -> 1
    halo = K - 1

    Kc = K * K * Cin
    Kc_pad = _round_up(Kc, 128)        # K-aligned MXU contraction
    Wp = W + 2 * pad
    out_bytes = jnp.dtype(out_dtype).itemsize

    th = _pick_tile_h(H, W, Wp, Cin, Cout, Kc_pad, tile_h, out_bytes, vmem_budget_bytes)
    n_row_tiles = H // th

    # Space-to-depth (same slice order as the torch.cat) -> (B, 4C, H, W), then a
    # (B, H, 4C, W) layout whose minor dims (4C, W) are sublane/lane dense both in HBM
    # and in the streamed VMEM blocks (no Cin->128 lane padding).  Halo-pad rows/cols
    # and cast once to bf16.
    fc = jnp.concatenate(
        [x[:, :, 0::2, 0::2], x[:, :, 1::2, 0::2],
         x[:, :, 0::2, 1::2], x[:, :, 1::2, 1::2]], axis=1)            # (B, 4C, H, W)
    fc = jnp.transpose(fc, (0, 2, 1, 3))                                # (B, H, 4C, W)
    bot = max(th, halo) - pad
    fc = jnp.pad(fc, ((0, 0), (pad, bot), (0, 0), (pad, pad))).astype(compute_dtype)

    # Conv weight OIHW -> (Cout, K*K*Cin), cols (kh, kw, cin)-major to match the
    # in-kernel tap order; zero-pad the contraction dim to a multiple of 128.
    w_t = jnp.transpose(w, (0, 2, 3, 1)).reshape(Cout, Kc)
    w_t = jnp.pad(w_t, ((0, 0), (0, Kc_pad - Kc))).astype(compute_dtype)

    # Fold eval-mode BatchNorm into one resident (Cout, 2) scale/bias array (f32).
    inv = gamma / jnp.sqrt(running_var + eps)
    affine = jnp.stack([inv, beta - running_mean * inv], axis=1).astype(jnp.float32)

    kernel = functools.partial(_focus_cbl_kernel, th=th, W=W, Cin=Cin, K=K, Kc_pad=Kc_pad)

    in_specs = [pl.BlockSpec((1, th, Cin, Wp), lambda b, r: (b, r, 0, 0))]
    # One single-row view per halo row -> only ~(th+halo)/th of the input is streamed.
    for j in range(halo):
        in_specs.append(
            pl.BlockSpec((1, 1, Cin, Wp), lambda b, r, j=j: (b, (r + 1) * th + j, 0, 0)))
    in_specs += [
        pl.BlockSpec((Cout, Kc_pad), lambda b, r: (0, 0)),   # resident weight
        pl.BlockSpec((Cout, 2), lambda b, r: (0, 0)),        # resident BN affine
    ]

    step_bytes = _step_vmem_bytes(th, W, Wp, Cin, Cout, Kc_pad, out_bytes)
    vmem_limit = int(min(96 * 1024 * 1024, max(32 * 1024 * 1024, 4 * step_bytes)))

    out = pl.pallas_call(
        kernel,
        out_shape=jax.ShapeDtypeStruct((B, Cout, H, W), out_dtype),
        grid=(B, n_row_tiles),
        in_specs=in_specs,
        out_specs=pl.BlockSpec((1, Cout, th, W), lambda b, r: (b, 0, r, 0)),
        compiler_params=pltpu.CompilerParams(
            dimension_semantics=("parallel", "parallel"),
            vmem_limit_bytes=vmem_limit,
        ),
    )(fc, *([fc] * halo), w_t, affine)
    return out   # already NCHW: no post-kernel slice / transpose pass


def _reference(x, w, gamma, beta, running_mean, running_var, eps=1e-5):
    # Same bf16 conv inputs / f32 accumulation as the kernel.
    fc = jnp.concatenate(
        [x[:, :, 0::2, 0::2], x[:, :, 1::2, 0::2],
         x[:, :, 0::2, 1::2], x[:, :, 1::2, 1::2]], axis=1)
    y = lax.conv_general_dilated(
        fc.astype(jnp.bfloat16), w.astype(jnp.bfloat16),
        window_strides=(1, 1), padding=((1, 1), (1, 1)),
        dimension_numbers=("NCHW", "OIHW", "NCHW"),
        preferred_element_type=jnp.float32)
    inv = gamma / jnp.sqrt(running_var + eps)
    y = y * inv.reshape(1, -1, 1, 1) + (beta - running_mean * inv).reshape(1, -1, 1, 1)
    return y * jax.nn.sigmoid(y)


if __name__ == "__main__":
    # Focus(c1=4, c2=8, k=3, s=1, p=1): conv is Conv2d(16, 8, 3, 1, 1, bias=False).
    B, C1, HIN, WIN = 2, 4, 32, 32
    C2, K = 8, 3

    key = jax.random.PRNGKey(0)
    kx, kw, kg, kb, km, kv = jax.random.split(key, 6)
    x = jax.random.normal(kx, (B, C1, HIN, WIN), dtype=jnp.float32)
    w = 0.1 * jax.random.normal(kw, (C2, 4 * C1, K, K), dtype=jnp.float32)
    gamma = 1.0 + 0.1 * jax.random.normal(kg, (C2,), dtype=jnp.float32)
    beta = 0.1 * jax.random.normal(kb, (C2,), dtype=jnp.float32)
    running_mean = 0.1 * jax.random.normal(km, (C2,), dtype=jnp.float32)
    running_var = jnp.abs(1.0 + 0.1 * jax.random.normal(kv, (C2,), dtype=jnp.float32))

    # tile_h=8 with H=W=16 -> grid (2, 2): exercises row tiling + the halo-row views.
    focus_fn = jax.jit(functools.partial(focus_forward, tile_h=8))
    out = jax.block_until_ready(focus_fn(x, w, gamma, beta, running_mean, running_var))

    ref = _reference(x, w, gamma, beta, running_mean, running_var)
    assert out.shape == (B, C2, HIN // 2, WIN // 2), out.shape
    max_err = float(jnp.max(jnp.abs(out - ref)))
    assert jnp.allclose(out, ref, atol=1e-2, rtol=1e-2), max_err

    print("KERNEL_OK")
</pallas_src>

<mosaic_0001>
module attributes {stable_mosaic.version = 11 : i64} {
  func.func @_focus_cbl_kernel(%arg0: i32, %arg1: i32, %arg2: memref<1x8x16x18xbf16, #tpu.memory_space<vmem>>, %arg3: memref<1x1x16x18xbf16, #tpu.memory_space<vmem>>, %arg4: memref<1x1x16x18xbf16, #tpu.memory_space<vmem>>, %arg5: memref<8x256xbf16, #tpu.memory_space<vmem>>, %arg6: memref<8x2xf32, #tpu.memory_space<vmem>>, %arg7: memref<1x8x8x16xf32, #tpu.memory_space<vmem>>) attributes {dimension_semantics = [#tpu.dimension_semantics<parallel>, #tpu.dimension_semantics<parallel>], iteration_bounds = array<i64: 2, 2>, scalar_prefetch = 0 : i64, scratch_operands = 0 : i64, tpu.core_type = #tpu.core_type<tc>, window_params = [{transform_indices = @transform_0, window_bounds = array<i64: 1, 8, 16, 18>}, {transform_indices = @transform_1, window_bounds = array<i64: 1, 1, 16, 18>}, {transform_indices = @transform_2, window_bounds = array<i64: 1, 1, 16, 18>}, {pipeline_mode = #tpu.pipeline_mode<synchronous>, transform_indices = @transform_3, window_bounds = array<i64: 8, 256>}, {pipeline_mode = #tpu.pipeline_mode<synchronous>, transform_indices = @transform_4, window_bounds = array<i64: 8, 2>}, {transform_indices = @transform_5, window_bounds = array<i64: 1, 8, 8, 16>}]} {
    %c0 = arith.constant 0 : index
    %c0_0 = arith.constant 0 : index
    %0 = vector.load %arg5[%c0, %c0_0] : memref<8x256xbf16, #tpu.memory_space<vmem>>, vector<8x256xbf16>
    %c0_1 = arith.constant 0 : index
    %c0_2 = arith.constant 0 : index
    %c0_3 = arith.constant 0 : index
    %c0_4 = arith.constant 0 : index
    %1 = vector.load %arg2[%c0_1, %c0_2, %c0_3, %c0_4] : memref<1x8x16x18xbf16, #tpu.memory_space<vmem>>, vector<1x8x16x18xbf16>
    %2 = vector.shape_cast %1 : vector<1x8x16x18xbf16> to vector<8x16x18xbf16>
    %3 = vector.extract_strided_slice %2 {offsets = [0, 0, 0], sizes = [1, 16, 18], strides = [1, 1, 1]} : vector<8x16x18xbf16> to vector<1x16x18xbf16>
    %4 = vector.shape_cast %3 : vector<1x16x18xbf16> to vector<16x18xbf16>
    %5 = vector.extract_strided_slice %2 {offsets = [1, 0, 0], sizes = [1, 16, 18], strides = [1, 1, 1]} : vector<8x16x18xbf16> to vector<1x16x18xbf16>
    %6 = vector.shape_cast %5 : vector<1x16x18xbf16> to vector<16x18xbf16>
    %7 = vector.extract_strided_slice %2 {offsets = [2, 0, 0], sizes = [1, 16, 18], strides = [1, 1, 1]} : vector<8x16x18xbf16> to vector<1x16x18xbf16>
    %8 = vector.shape_cast %7 : vector<1x16x18xbf16> to vector<16x18xbf16>
    %9 = vector.extract_strided_slice %2 {offsets = [3, 0, 0], sizes = [1, 16, 18], strides = [1, 1, 1]} : vector<8x16x18xbf16> to vector<1x16x18xbf16>
    %10 = vector.shape_cast %9 : vector<1x16x18xbf16> to vector<16x18xbf16>
    %11 = vector.extract_strided_slice %2 {offsets = [4, 0, 0], sizes = [1, 16, 18], strides = [1, 1, 1]} : vector<8x16x18xbf16> to vector<1x16x18xbf16>
    %12 = vector.shape_cast %11 : vector<1x16x18xbf16> to vector<16x18xbf16>
    %13 = vector.extract_strided_slice %2 {offsets = [5, 0, 0], sizes = [1, 16, 18], strides = [1, 1, 1]} : vector<8x16x18xbf16> to vector<1x16x18xbf16>
    %14 = vector.shape_cast %13 : vector<1x16x18xbf16> to vector<16x18xbf16>
    %15 = vector.extract_strided_slice %2 {offsets = [6, 0, 0], sizes = [1, 16, 18], strides = [1, 1, 1]} : vector<8x16x18xbf16> to vector<1x16x18xbf16>
    %16 = vector.shape_cast %15 : vector<1x16x18xbf16> to vector<16x18xbf16>
    %17 = vector.extract_strided_slice %2 {offsets = [7, 0, 0], sizes = [1, 16, 18], strides = [1, 1, 1]} : vector<8x16x18xbf16> to vector<1x16x18xbf16>
    %18 = vector.shape_cast %17 : vector<1x16x18xbf16> to vector<16x18xbf16>
    %c0_5 = arith.constant 0 : index
    %c0_6 = arith.constant 0 : index
    %c0_7 = arith.constant 0 : index
    %c0_8 = arith.constant 0 : index
    %19 = vector.load %arg3[%c0_5, %c0_6, %c0_7, %c0_8] : memref<1x1x16x18xbf16, #tpu.memory_space<vmem>>, vector<1x1x16x18xbf16>
    %20 = vector.shape_cast %19 : vector<1x1x16x18xbf16> to vector<16x18xbf16>
    %c0_9 = arith.constant 0 : index
    %c0_10 = arith.constant 0 : index
    %c0_11 = arith.constant 0 : index
    %c0_12 = arith.constant 0 : index
    %21 = vector.load %arg4[%c0_9, %c0_10, %c0_11, %c0_12] : memref<1x1x16x18xbf16, #tpu.memory_space<vmem>>, vector<1x1x16x18xbf16>
    %22 = vector.shape_cast %21 : vector<1x1x16x18xbf16> to vector<16x18xbf16>
    %cst = arith.constant 0.000000e+00 : bf16
    %23 = vector.broadcast %cst : bf16 to vector<112x16xbf16>
    %24 = vector.extract_strided_slice %4 {offsets = [0, 0], sizes = [16, 16], strides = [1, 1]} : vector<16x18xbf16> to vector<16x16xbf16>
    %25 = vector.extract_strided_slice %4 {offsets = [0, 1], sizes = [16, 16], strides = [1, 1]} : vector<16x18xbf16> to vector<16x16xbf16>
    %26 = vector.extract_strided_slice %4 {offsets = [0, 2], sizes = [16, 16], strides = [1, 1]} : vector<16x18xbf16> to vector<16x16xbf16>
    %27 = vector.extract_strided_slice %6 {offsets = [0, 0], sizes = [16, 16], strides = [1, 1]} : vector<16x18xbf16> to vector<16x16xbf16>
    %28 = vector.extract_strided_slice %6 {offsets = [0, 1], sizes = [16, 16], strides = [1, 1]} : vector<16x18xbf16> to vector<16x16xbf16>
    %29 = vector.extract_strided_slice %6 {offsets = [0, 2], sizes = [16, 16], strides = [1, 1]} : vector<16x18xbf16> to vector<16x16xbf16>
    %30 = vector.extract_strided_slice %8 {offsets = [0, 0], sizes = [16, 16], strides = [1, 1]} : vector<16x18xbf16> to vector<16x16xbf16>
    %31 = vector.extract_strided_slice %8 {offsets = [0, 1], sizes = [16, 16], strides = [1, 1]} : vector<16x18xbf16> to vector<16x16xbf16>
    %32 = vector.extract_strided_slice %8 {offsets = [0, 2], sizes = [16, 16], strides = [1, 1]} : vector<16x18xbf16> to vector<16x16xbf16>
    %33 = tpu.concatenate %24, %25, %26, %27, %28, %29, %30, %31, %32, %23 in 0 : vector<16x16xbf16>, vector<16x16xbf16>, vector<16x16xbf16>, vector<16x16xbf16>, vector<16x16xbf16>, vector<16x16xbf16>, vector<16x16xbf16>, vector<16x16xbf16>, vector<16x16xbf16>, vector<112x16xbf16> -> vector<256x16xbf16>
    %cst_13 = arith.constant dense<0.000000e+00> : vector<8x16xf32>
    %34 = tpu.matmul %0, %33, %cst_13 {dimension_numbers = #tpu.dot_dimension_numbers<[1], [0], [0], [1], [0, 0, 1, 1], [], []>} : vector<8x256xbf16>, vector<256x16xbf16>, vector<8x16xf32> -> vector<8x16xf32>
    %35 = vector.shape_cast %34 : vector<8x16xf32> to vector<8x1x16xf32>
    %36 = vector.extract_strided_slice %6 {offsets = [0, 0], sizes = [16, 16], strides = [1, 1]} : vector<16x18xbf16> to vector<16x16xbf16>
    %37 = vector.extract_strided_slice %6 {offsets = [0, 1], sizes = [16, 16], strides = [1, 1]} : vector<16x18xbf16> to vector<16x16xbf16>
    %38 = vector.extract_strided_slice %6 {offsets = [0, 2], sizes = [16, 16], strides = [1, 1]} : vector<16x18xbf16> to vector<16x16xbf16>
    %39 = vector.extract_strided_slice %8 {offsets = [0, 0], sizes = [16, 16], strides = [1, 1]} : vector<16x18xbf16> to vector<16x16xbf16>
    %40 = vector.extract_strided_slice %8 {offsets = [0, 1], sizes = [16, 16], strides = [1, 1]} : vector<16x18xbf16> to vector<16x16xbf16>
    %41 = vector.extract_strided_slice %8 {offsets = [0, 2], sizes = [16, 16], strides = [1, 1]} : vector<16x18xbf16> to vector<16x16xbf16>
    %42 = vector.extract_strided_slice %10 {offsets = [0, 0], sizes = [16, 16], strides = [1, 1]} : vector<16x18xbf16> to vector<16x16xbf16>
    %43 = vector.extract_strided_slice %10 {offsets = [0, 1], sizes = [16, 16], strides = [1, 1]} : vector<16x18xbf16> to vector<16x16xbf16>
    %44 = vector.extract_strided_slice %10 {offsets = [0, 2], sizes = [16, 16], strides = [1, 1]} : vector<16x18xbf16> to vector<16x16xbf16>
    %45 = tpu.concatenate %36, %37, %38, %39, %40, %41, %42, %43, %44, %23 in 0 : vector<16x16xbf16>, vector<16x16xbf16>, vector<16x16xbf16>, vector<16x16xbf16>, vector<16x16xbf16>, vector<16x16xbf16>, vector<16x16xbf16>, vector<16x16xbf16>, vector<16x16xbf16>, vector<112x16xbf16> -> vector<256x16xbf16>
    %cst_14 = arith.constant dense<0.000000e+00> : vector<8x16xf32>
    %46 = tpu.matmul %0, %45, %cst_14 {dimension_numbers = #tpu.dot_dimension_numbers<[1], [0], [0], [1], [0, 0, 1, 1], [], []>} : vector<8x256xbf16>, vector<256x16xbf16>, vector<8x16xf32> -> vector<8x16xf32>
    %47 = vector.shape_cast %46 : vector<8x16xf32> to vector<8x1x16xf32>
    %48 = vector.extract_strided_slice %8 {offsets = [0, 0], sizes = [16, 16], strides = [1, 1]} : vector<16x18xbf16> to vector<16x16xbf16>
    %49 = vector.extract_strided_slice %8 {offsets = [0, 1], sizes = [16, 16], strides = [1, 1]} : vector<16x18xbf16> to vector<16x16xbf16>
    %50 = vector.extract_strided_slice %8 {offsets = [0, 2], sizes = [16, 16], strides = [1, 1]} : vector<16x18xbf16> to vector<16x16xbf16>
    %51 = vector.extract_strided_slice %10 {offsets = [0, 0], sizes = [16, 16], strides = [1, 1]} : vector<16x18xbf16> to vector<16x16xbf16>
    %52 = vector.extract_strided_slice %10 {offsets = [0, 1], sizes = [16, 16], strides = [1, 1]} : vector<16x18xbf16> to vector<16x16xbf16>
    %53 = vector.extract_strided_slice %10 {offsets = [0, 2], sizes = [16, 16], strides = [1, 1]} : vector<16x18xbf16> to vector<16x16xbf16>
    %54 = vector.extract_strided_slice %12 {offsets = [0, 0], sizes = [16, 16], strides = [1, 1]} : vector<16x18xbf16> to vector<16x16xbf16>
    %55 = vector.extract_strided_slice %12 {offsets = [0, 1], sizes = [16, 16], strides = [1, 1]} : vector<16x18xbf16> to vector<16x16xbf16>
    %56 = vector.extract_strided_slice %12 {offsets = [0, 2], sizes = [16, 16], strides = [1, 1]} : vector<16x18xbf16> to vector<16x16xbf16>
    %57 = tpu.concatenate %48, %49, %50, %51, %52, %53, %54, %55, %56, %23 in 0 : vector<16x16xbf16>, vector<16x16xbf16>, vector<16x16xbf16>, vector<16x16xbf16>, vector<16x16xbf16>, vector<16x16xbf16>, vector<16x16xbf16>, vector<16x16xbf16>, vector<16x16xbf16>, vector<112x16xbf16> -> vector<256x16xbf16>
    %cst_15 = arith.constant dense<0.000000e+00> : vector<8x16xf32>
    %58 = tpu.matmul %0, %57, %cst_15 {dimension_numbers = #tpu.dot_dimension_numbers<[1], [0], [0], [1], [0, 0, 1, 1], [], []>} : vector<8x256xbf16>, vector<256x16xbf16>, vector<8x16xf32> -> vector<8x16xf32>
    %59 = vector.shape_cast %58 : vector<8x16xf32> to vector<8x1x16xf32>
    %60 = vector.extract_strided_slice %10 {offsets = [0, 0], sizes = [16, 16], strides = [1, 1]} : vector<16x18xbf16> to vector<16x16xbf16>
    %61 = vector.extract_strided_slice %10 {offsets = [0, 1], sizes = [16, 16], strides = [1, 1]} : vector<16x18xbf16> to vector<16x16xbf16>
    %62 = vector.extract_strided_slice %10 {offsets = [0, 2], sizes = [16, 16], strides = [1, 1]} : vector<16x18xbf16> to vector<16x16xbf16>
    %63 = vector.extract_strided_slice %12 {offsets = [0, 0], sizes = [16, 16], strides = [1, 1]} : vector<16x18xbf16> to vector<16x16xbf16>
    %64 = vector.extract_strided_slice %12 {offsets = [0, 1], sizes = [16, 16], strides = [1, 1]} : vector<16x18xbf16> to vector<16x16xbf16>
    %65 = vector.extract_strided_slice %12 {offsets = [0, 2], sizes = [16, 16], strides = [1, 1]} : vector<16x18xbf16> to vector<16x16xbf16>
    %66 = vector.extract_strided_slice %14 {offsets = [0, 0], sizes = [16, 16], strides = [1, 1]} : vector<16x18xbf16> to vector<16x16xbf16>
    %67 = vector.extract_strided_slice %14 {offsets = [0, 1], sizes = [16, 16], strides = [1, 1]} : vector<16x18xbf16> to vector<16x16xbf16>
    %68 = vector.extract_strided_slice %14 {offsets = [0, 2], sizes = [16, 16], strides = [1, 1]} : vector<16x18xbf16> to vector<16x16xbf16>
    %69 = tpu.concatenate %60, %61, %62, %63, %64, %65, %66, %67, %68, %23 in 0 : vector<16x16xbf16>, vector<16x16xbf16>, vector<16x16xbf16>, vector<16x16xbf16>, vector<16x16xbf16>, vector<16x16xbf16>, vector<16x16xbf16>, vector<16x16xbf16>, vector<16x16xbf16>, vector<112x16xbf16> -> vector<256x16xbf16>
    %cst_16 = arith.constant dense<0.000000e+00> : vector<8x16xf32>
    %70 = tpu.matmul %0, %69, %cst_16 {dimension_numbers = #tpu.dot_dimension_numbers<[1], [0], [0], [1], [0, 0, 1, 1], [], []>} : vector<8x256xbf16>, vector<256x16xbf16>, vector<8x16xf32> -> vector<8x16xf32>
    %71 = vector.shape_cast %70 : vector<8x16xf32> to vector<8x1x16xf32>
    %72 = vector.extract_strided_slice %12 {offsets = [0, 0], sizes = [16, 16], strides = [1, 1]} : vector<16x18xbf16> to vector<16x16xbf16>
    %73 = vector.extract_strided_slice %12 {offsets = [0, 1], sizes = [16, 16], strides = [1, 1]} : vector<16x18xbf16> to vector<16x16xbf16>
    %74 = vector.extract_strided_slice %12 {offsets = [0, 2], sizes = [16, 16], strides = [1, 1]} : vector<16x18xbf16> to vector<16x16xbf16>
    %75 = vector.extract_strided_slice %14 {offsets = [0, 0], sizes = [16, 16], strides = [1, 1]} : vector<16x18xbf16> to vector<16x16xbf16>
    %76 = vector.extract_strided_slice %14 {offsets = [0, 1], sizes = [16, 16], strides = [1, 1]} : vector<16x18xbf16> to vector<16x16xbf16>
    %77 = vector.extract_strided_slice %14 {offsets = [0, 2], sizes = [16, 16], strides = [1, 1]} : vector<16x18xbf16> to vector<16x16xbf16>
    %78 = vector.extract_strided_slice %16 {offsets = [0, 0], sizes = [16, 16], strides = [1, 1]} : vector<16x18xbf16> to vector<16x16xbf16>
    %79 = vector.extract_strided_slice %16 {offsets = [0, 1], sizes = [16, 16], strides = [1, 1]} : vector<16x18xbf16> to vector<16x16xbf16>
    %80 = vector.extract_strided_slice %16 {offsets = [0, 2], sizes = [16, 16], strides = [1, 1]} : vector<16x18xbf16> to vector<16x16xbf16>
    %81 = tpu.concatenate %72, %73, %74, %75, %76, %77, %78, %79, %80, %23 in 0 : vector<16x16xbf16>, vector<16x16xbf16>, vector<16x16xbf16>, vector<16x16xbf16>, vector<16x16xbf16>, vector<16x16xbf16>, vector<16x16xbf16>, vector<16x16xbf16>, vector<16x16xbf16>, vector<112x16xbf16> -> vector<256x16xbf16>
    %cst_17 = arith.constant dense<0.000000e+00> : vector<8x16xf32>
    %82 = tpu.matmul %0, %81, %cst_17 {dimension_numbers = #tpu.dot_dimension_numbers<[1], [0], [0], [1], [0, 0, 1, 1], [], []>} : vector<8x256xbf16>, vector<256x16xbf16>, vector<8x16xf32> -> vector<8x16xf32>
    %83 = vector.shape_cast %82 : vector<8x16xf32> to vector<8x1x16xf32>
    %84 = vector.extract_strided_slice %14 {offsets = [0, 0], sizes = [16, 16], strides = [1, 1]} : vector<16x18xbf16> to vector<16x16xbf16>
    %85 = vector.extract_strided_slice %14 {offsets = [0, 1], sizes = [16, 16], strides = [1, 1]} : vector<16x18xbf16> to vector<16x16xbf16>
    %86 = vector.extract_strided_slice %14 {offsets = [0, 2], sizes = [16, 16], strides = [1, 1]} : vector<16x18xbf16> to vector<16x16xbf16>
    %87 = vector.extract_strided_slice %16 {offsets = [0, 0], sizes = [16, 16], strides = [1, 1]} : vector<16x18xbf16> to vector<16x16xbf16>
    %88 = vector.extract_strided_slice %16 {offsets = [0, 1], sizes = [16, 16], strides = [1, 1]} : vector<16x18xbf16> to vector<16x16xbf16>
    %89 = vector.extract_strided_slice %16 {offsets = [0, 2], sizes = [16, 16], strides = [1, 1]} : vector<16x18xbf16> to vector<16x16xbf16>
    %90 = vector.extract_strided_slice %18 {offsets = [0, 0], sizes = [16, 16], strides = [1, 1]} : vector<16x18xbf16> to vector<16x16xbf16>
    %91 = vector.extract_strided_slice %18 {offsets = [0, 1], sizes = [16, 16], strides = [1, 1]} : vector<16x18xbf16> to vector<16x16xbf16>
    %92 = vector.extract_strided_slice %18 {offsets = [0, 2], sizes = [16, 16], strides = [1, 1]} : vector<16x18xbf16> to vector<16x16xbf16>
    %93 = tpu.concatenate %84, %85, %86, %87, %88, %89, %90, %91, %92, %23 in 0 : vector<16x16xbf16>, vector<16x16xbf16>, vector<16x16xbf16>, vector<16x16xbf16>, vector<16x16xbf16>, vector<16x16xbf16>, vector<16x16xbf16>, vector<16x16xbf16>, vector<16x16xbf16>, vector<112x16xbf16> -> vector<256x16xbf16>
    %cst_18 = arith.constant dense<0.000000e+00> : vector<8x16xf32>
    %94 = tpu.matmul %0, %93, %cst_18 {dimension_numbers = #tpu.dot_dimension_numbers<[1], [0], [0], [1], [0, 0, 1, 1], [], []>} : vector<8x256xbf16>, vector<256x16xbf16>, vector<8x16xf32> -> vector<8x16xf32>
    %95 = vector.shape_cast %94 : vector<8x16xf32> to vector<8x1x16xf32>
    %96 = vector.extract_strided_slice %16 {offsets = [0, 0], sizes = [16, 16], strides = [1, 1]} : vector<16x18xbf16> to vector<16x16xbf16>
    %97 = vector.extract_strided_slice %16 {offsets = [0, 1], sizes = [16, 16], strides = [1, 1]} : vector<16x18xbf16> to vector<16x16xbf16>
    %98 = vector.extract_strided_slice %16 {offsets = [0, 2], sizes = [16, 16], strides = [1, 1]} : vector<16x18xbf16> to vector<16x16xbf16>
    %99 = vector.extract_strided_slice %18 {offsets = [0, 0], sizes = [16, 16], strides = [1, 1]} : vector<16x18xbf16> to vector<16x16xbf16>
    %100 = vector.extract_strided_slice %18 {offsets = [0, 1], sizes = [16, 16], strides = [1, 1]} : vector<16x18xbf16> to vector<16x16xbf16>
    %101 = vector.extract_strided_slice %18 {offsets = [0, 2], sizes = [16, 16], strides = [1, 1]} : vector<16x18xbf16> to vector<16x16xbf16>
    %102 = vector.extract_strided_slice %20 {offsets = [0, 0], sizes = [16, 16], strides = [1, 1]} : vector<16x18xbf16> to vector<16x16xbf16>
    %103 = vector.extract_strided_slice %20 {offsets = [0, 1], sizes = [16, 16], strides = [1, 1]} : vector<16x18xbf16> to vector<16x16xbf16>
    %104 = vector.extract_strided_slice %20 {offsets = [0, 2], sizes = [16, 16], strides = [1, 1]} : vector<16x18xbf16> to vector<16x16xbf16>
    %105 = tpu.concatenate %96, %97, %98, %99, %100, %101, %102, %103, %104, %23 in 0 : vector<16x16xbf16>, vector<16x16xbf16>, vector<16x16xbf16>, vector<16x16xbf16>, vector<16x16xbf16>, vector<16x16xbf16>, vector<16x16xbf16>, vector<16x16xbf16>, vector<16x16xbf16>, vector<112x16xbf16> -> vector<256x16xbf16>
    %cst_19 = arith.constant dense<0.000000e+00> : vector<8x16xf32>
    %106 = tpu.matmul %0, %105, %cst_19 {dimension_numbers = #tpu.dot_dimension_numbers<[1], [0], [0], [1], [0, 0, 1, 1], [], []>} : vector<8x256xbf16>, vector<256x16xbf16>, vector<8x16xf32> -> vector<8x16xf32>
    %107 = vector.shape_cast %106 : vector<8x16xf32> to vector<8x1x16xf32>
    %108 = vector.extract_strided_slice %18 {offsets = [0, 0], sizes = [16, 16], strides = [1, 1]} : vector<16x18xbf16> to vector<16x16xbf16>
    %109 = vector.extract_strided_slice %18 {offsets = [0, 1], sizes = [16, 16], strides = [1, 1]} : vector<16x18xbf16> to vector<16x16xbf16>
    %110 = vector.extract_strided_slice %18 {offsets = [0, 2], sizes = [16, 16], strides = [1, 1]} : vector<16x18xbf16> to vector<16x16xbf16>
    %111 = vector.extract_strided_slice %20 {offsets = [0, 0], sizes = [16, 16], strides = [1, 1]} : vector<16x18xbf16> to vector<16x16xbf16>
    %112 = vector.extract_strided_slice %20 {offsets = [0, 1], sizes = [16, 16], strides = [1, 1]} : vector<16x18xbf16> to vector<16x16xbf16>
    %113 = vector.extract_strided_slice %20 {offsets = [0, 2], sizes = [16, 16], strides = [1, 1]} : vector<16x18xbf16> to vector<16x16xbf16>
    %114 = vector.extract_strided_slice %22 {offsets = [0, 0], sizes = [16, 16], strides = [1, 1]} : vector<16x18xbf16> to vector<16x16xbf16>
    %115 = vector.extract_strided_slice %22 {offsets = [0, 1], sizes = [16, 16], strides = [1, 1]} : vector<16x18xbf16> to vector<16x16xbf16>
    %116 = vector.extract_strided_slice %22 {offsets = [0, 2], sizes = [16, 16], strides = [1, 1]} : vector<16x18xbf16> to vector<16x16xbf16>
    %117 = tpu.concatenate %108, %109, %110, %111, %112, %113, %114, %115, %116, %23 in 0 : vector<16x16xbf16>, vector<16x16xbf16>, vector<16x16xbf16>, vector<16x16xbf16>, vector<16x16xbf16>, vector<16x16xbf16>, vector<16x16xbf16>, vector<16x16xbf16>, vector<16x16xbf16>, vector<112x16xbf16> -> vector<256x16xbf16>
    %cst_20 = arith.constant dense<0.000000e+00> : vector<8x16xf32>
    %118 = tpu.matmul %0, %117, %cst_20 {dimension_numbers = #tpu.dot_dimension_numbers<[1], [0], [0], [1], [0, 0, 1, 1], [], []>} : vector<8x256xbf16>, vector<256x16xbf16>, vector<8x16xf32> -> vector<8x16xf32>
    %119 = vector.shape_cast %118 : vector<8x16xf32> to vector<8x1x16xf32>
    %120 = tpu.concatenate %35, %47, %59, %71, %83, %95, %107, %119 in 1 : vector<8x1x16xf32>, vector<8x1x16xf32>, vector<8x1x16xf32>, vector<8x1x16xf32>, vector<8x1x16xf32>, vector<8x1x16xf32>, vector<8x1x16xf32>, vector<8x1x16xf32> -> vector<8x8x16xf32>
    %c0_21 = arith.constant 0 : index
    %c0_22 = arith.constant 0 : index
    %121 = vector.load %arg6[%c0_21, %c0_22] : memref<8x2xf32, #tpu.memory_space<vmem>>, vector<8x2xf32>
    %122 = vector.extract_strided_slice %121 {offsets = [0, 0], sizes = [8, 1], strides = [1, 1]} : vector<8x2xf32> to vector<8x1xf32>
    %123 = vector.shape_cast %122 : vector<8x1xf32> to vector<8x1x1xf32>
    %124 = vector.extract_strided_slice %121 {offsets = [0, 1], sizes = [8, 1], strides = [1, 1]} : vector<8x2xf32> to vector<8x1xf32>
    %125 = vector.shape_cast %124 : vector<8x1xf32> to vector<8x1x1xf32>
    %126 = vector.broadcast %123 : vector<8x1x1xf32> to vector<8x8x16xf32>
    %127 = arith.mulf %120, %126 : vector<8x8x16xf32>
    %128 = vector.broadcast %125 : vector<8x1x1xf32> to vector<8x8x16xf32>
    %129 = arith.addf %127, %128 : vector<8x8x16xf32>
    %130 = arith.negf %129 : vector<8x8x16xf32>
    %131 = math.exp %130 : vector<8x8x16xf32>
    %cst_23 = arith.constant 1.000000e+00 : f32
    %132 = vector.broadcast %cst_23 : f32 to vector<8x8x16xf32>
    %133 = arith.addf %132, %131 : vector<8x8x16xf32>
    %134 = arith.divf %132, %133 : vector<8x8x16xf32>
    %135 = arith.mulf %129, %134 : vector<8x8x16xf32>
    %c0_24 = arith.constant 0 : index
    %c0_25 = arith.constant 0 : index
    %c0_26 = arith.constant 0 : index
    %c0_27 = arith.constant 0 : index
    %136 = vector.load %arg7[%c0_24, %c0_25, %c0_26, %c0_27] : memref<1x8x8x16xf32, #tpu.memory_space<vmem>>, vector<1x8x8x16xf32>
    %137 = vector.shape_cast %136 : vector<1x8x8x16xf32> to vector<8x8x16xf32>
    %138 = vector.shape_cast %135 : vector<8x8x16xf32> to vector<1x8x8x16xf32>
    tpu.vector_store %arg7[%c0_24, %c0_25, %c0_26, %c0_27], %138 {strides = array<i32>} : memref<1x8x8x16xf32, #tpu.memory_space<vmem>>, vector<1x8x8x16xf32>,
    return
  }
  func.func @transform_0(%arg0: i32, %arg1: i32) -> (i32, i32, i32, i32) {
    %c0_i32 = arith.constant 0 : i32
    %c0_i32_0 = arith.constant 0 : i32
    %c0_i32_1 = arith.constant 0 : i32
    return %arg0, %arg1, %c0_i32, %c0_i32_0 : i32, i32, i32, i32
  }
  func.func @transform_1(%arg0: i32, %arg1: i32) -> (i32, i32, i32, i32) {
    %c1_i32 = arith.constant 1 : i32
    %0 = arith.addi %arg1, %c1_i32 : i32
    %c8_i32 = arith.constant 8 : i32
    %1 = arith.muli %0, %c8_i32 : i32
    %c0_i32 = arith.constant 0 : i32
    %2 = arith.addi %1, %c0_i32 : i32
    %c0_i32_0 = arith.constant 0 : i32
    %c0_i32_1 = arith.constant 0 : i32
    %c0_i32_2 = arith.constant 0 : i32
    return %arg0, %2, %c0_i32_0, %c0_i32_1 : i32, i32, i32, i32
  }
  func.func @transform_2(%arg0: i32, %arg1: i32) -> (i32, i32, i32, i32) {
    %c1_i32 = arith.constant 1 : i32
    %0 = arith.addi %arg1, %c1_i32 : i32
    %c8_i32 = arith.constant 8 : i32
    %1 = arith.muli %0, %c8_i32 : i32
    %c1_i32_0 = arith.constant 1 : i32
    %2 = arith.addi %1, %c1_i32_0 : i32
    %c0_i32 = arith.constant 0 : i32
    %c0_i32_1 = arith.constant 0 : i32
    %c0_i32_2 = arith.constant 0 : i32
    return %arg0, %2, %c0_i32, %c0_i32_1 : i32, i32, i32, i32
  }
  func.func @transform_3(%arg0: i32, %arg1: i32) -> (i32, i32) {
    %c0_i32 = arith.constant 0 : i32
    %c0_i32_0 = arith.constant 0 : i32
    %c0_i32_1 = arith.constant 0 : i32
    return %c0_i32, %c0_i32_0 : i32, i32
  }
  func.func @transform_4(%arg0: i32, %arg1: i32) -> (i32, i32) {
    %c0_i32 = arith.constant 0 : i32
    %c0_i32_0 = arith.constant 0 : i32
    %c0_i32_1 = arith.constant 0 : i32
    return %c0_i32, %c0_i32_0 : i32, i32
  }
  func.func @transform_5(%arg0: i32, %arg1: i32) -> (i32, i32, i32, i32) {
    %c0_i32 = arith.constant 0 : i32
    %c0_i32_0 = arith.constant 0 : i32
    %c0_i32_1 = arith.constant 0 : i32
    return %arg0, %c0_i32, %arg1, %c0_i32_0 : i32, i32, i32, i32
  }
}

</mosaic_0001>

<bundles_post_ra>
// kernel: focus_forward.1
= control target key start
LH: loop header
LB: loop body
LE: loop exit
PB: predicated region body
PF: predicated region fallthrough
CT: control target
= control target key end

     0   :  { %s2379_s0 = inlined_call_operand.vmem [shape: bf16[2,24,16,18], index: 0, kind: input, shape index: {}, may-alias: {0,1,2}]   ;;  %s2380_s1 = inlined_call_operand.vmem [shape: bf16[2,24,16,18], index: 1, kind: input, shape index: {}, may-alias: {0,1,2}]   ;;  %s2381_s2 = inlined_call_operand.vmem [shape: bf16[2,24,16,18], index: 2, kind: input, shape index: {}, may-alias: {0,1,2}]   ;;  %s2382_s3 = inlined_call_operand.vmem [shape: bf16[8,256], index: 3, kind: input, shape index: {}]   ;;  %s2383_s4 = inlined_call_operand.vmem [shape: f32[8,2], index: 4, kind: input, shape index: {}]   ;;  %s2384_s5 = inlined_call_operand.hbm [shape: f32[2,8,16,16], index: 5, kind: output, shape index: {}]  }
   0x1   :  { %2387 = sst [smem:[#allocation7_spill]] %s2379_s0 }
   0x2   :  { %10 = vsyncpa [#allocation3], 0 }
   0x3   :  { %12 = vsyncpa [#allocation3 + $0x1], 0  ;;  %s1715_s18 = smov 0   ;;  %s1717_s19 = smov 0  }
   0x4   :  { %s1719_s20 = smov 0   ;;  %s1721_s21 = smov 0  }
   0x5   :  { %s1723_s22 = smov 0   ;;  %s1725_s23 = smov 0  }
   0x6   :  { %s1727_s24 = smov 0   ;;  %s1729_s25 = smov 0  }
   0x7 LB: > { %s1371_s26 = sadd.s32 4294967295, %s1676_s25   ;;  %s1372_s27 = sadd.s32 4294967294, %s1676_s25   ;;  %s1676_s25 = sphi %s1729_s25, %s18_s25   ;;  %s1672_s24 = sphi %s1727_s24, %s2417_s24   ;;  %s1668_s23 = sphi %s1725_s23, %s2416_s23   ;;  %s1664_s22 = sphi %s1723_s22, %s2415_s22   ;;  %s1660_s21 = sphi %s1721_s21, %s2414_s21   ;;  %s1656_s20 = sphi %s1719_s20, %s2413_s20   ;;  %s1652_s19 = sphi %s1717_s19, %s2412_s19   ;;  %s1648_s18 = sphi %s1715_s18, %s2411_s18  }
   0x8   : > { %s27_s28 = sadd.s32 1, %s1668_s23  ;;  %s30_s29 = sadd.s32 1, %s1672_s24 }
   0x9   : > { %p28_p0 = scmp.ge.s32.totalorder %s27_s28, 2  ;;  %p185_p1 = scmp.ne.s32.totalorder %s1656_s20, %s1652_s19 }
   0xa   : > { %p186_p2 = scmp.eq.s32.totalorder %s1371_s26, 3  ;;  %p191_p5 = scmp.ne.s32.totalorder %s1652_s19, %s1648_s18 }
   0xb   : > { %s2419_s28 = smov (%p28_p0, %s27_s28), 0  ;;  %s2421_s29 = smov (!%p28_p0, %s30_s29), %s1672_s24 }
   0xc   : > { %2388 = sst [smem:[#allocation5_spill]] %s2419_s28  ;;  %s171_s30 = ssub.s32 %s1668_s23, %s2419_s28 }
   0xd   : > { %p1766_p3 = por %p186_p2, %p185_p1  ;;  %p32_p4 = scmp.ge.s32.totalorder %s2421_s29, 2 }
   0xe   : > { %p192_p6 = scmp.eq.s32.totalorder %s1372_s27, 3  ;;  %p1379_p7 = scmp.ge.s32.totalorder %s1676_s25, 1 }
   0xf   : > { %s2423_s29 = smov (%p32_p4, %s2421_s29), 0  ;;  %p264_p9 = scmp.lt.s32.totalorder %s1676_s25, 5 }
  0x10   : > { %2390 = sst [smem:[#allocation6_spill]] %s2423_s29  ;;  %p1775_p8 = por %p192_p6, %p191_p5 }
  0x11   : > { %s170_s8 = ssub.s32 %s1672_s24, %s2423_s29  ;;  %s175_s9 = sadd.s32 1, %s1656_s20 }
  0x12   : > { %s172_s10 = sor.u32 %s171_s30, %s170_s8  ;;  %p265_p10 = pnand %p1379_p7, %p264_p9 }
  0x13   : > { %p173_p11 = scmp.eq.s32.totalorder %s172_s10, 0  ;;  %s1381_s12 = sshll.u32 (!%p265_p10), %s1660_s21, 3 }
  0x14   : > { %268 = sbr.rel (%p265_p10) target bundleno = 446 (0x1be), region = 40  ;;  %p321_p12 = scmp.lt.s32.totalorder (!%p265_p10), %s1664_s22, 1 }
  0x15   : > { %s1784_s11 = scalar_select %p173_p11, %s1656_s20, %s175_s9  }
  0x16   : > { %p323_p13 = scmp.lt.s32.totalorder (!%p265_p10), %s1381_s12, 23  ;;  %s2392_s0 = sld [smem:[#allocation7_spill]] (!%p265_p10) }
  0x17   : > { %s1678_s9 = smov (!%p265_p10), 127   ;;  %s1679_s10 = smov (!%p265_p10), 126  }
  0x19   : > { %s322_s13 = scalar_select %p321_p12, %s1664_s22, 1  ;;  %v360_v14 = vld [vmem:[%s2382_s3] sm:$0xff]  ;;  %v1680_v32 = vmov 0   ;;  %v1681_v44 = vmov 1   ;;  %vm899_vm0 = vcmask 1040384   ;;  %vm908_vm1 = vcmask 1041408  }
  0x1a   : > { %s324_s14 = scalar_select %p323_p13, %s1381_s12, 23  ;;  %v419_v15 = vunpack.c.h.b16 %v360_v14  ;;  %v418_v25 = vunpack.c.l.b16 %v360_v14  ;;  %v1898_v26 = vld [vmem:[%s2383_s4] sm:$0xff]  ;;  %1546 = vset.pattern.permute.xlu1 %v1680_v32  ;;  %1545 = vset.pattern.permute.xlu0 %v1680_v32  ;;  %vm917_vm2 = vcmask 1042432   ;;  %vm926_vm3 = vcmask 1043456  }
  0x1b   : > { %s1789_s15 = smul.u32 48, %s322_s13  ;;  %s1452_s13 = sadd.s32 8, %s1381_s12  ;;  %v965_v28 = vrot.slane %v1898_v26, 2  ;;  %v967_v35 = vrot.slane %v1898_v26, 4  ;;  %1544 = vset.pattern.permute.xlu2 %v1680_v32  ;;  %v970_v37 = vrot.slane %v1898_v26, 7  ;;  %v964_v41 = vrot.slane %v1898_v26, 1 }
  0x1c   : > { %s1382_s16 = sshll.u32 %s324_s14, 1  ;;  %s346_s14 = sadd.s32 1, %s1452_s13  ;;  %v1877_v19 = vpack.c.b16 %v419_v15, %v419_v15  ;;  %v1904_v29 = vpack.c.b16 %v418_v25, %v418_v25  ;;  %v971_v43 = vperm.slane %v1898_v26, 0  ;;  %v969_v47 = vrot.slane %v1898_v26, 6 }
  0x1d   : > { %s327_s17 = sadd.s32 %s1789_s15, %s1382_s16  ;;  %p335_p0 = scmp.lt.s32.totalorder %s1452_s13, 23  ;;  %v973_v33 = vperm.slane %v965_v28, 0  ;;  %v975_v36 = vperm.slane %v967_v35, 0  ;;  %v978_v38 = vperm.slane %v970_v37, 0  ;;  %v972_v42 = vperm.slane %v964_v41, 0 }
  0x1e   : > { %s1383_s26 = sshll.u32 %s327_s17, 2  ;;  %p349_p1 = scmp.lt.s32.totalorder %s346_s14, 23  ;;  %v966_v48 = vrot.slane %v1898_v26, 3  ;;  %v977_v49 = vperm.slane %v969_v47, 0  ;;  %v968_v51 = vrot.slane %v1898_v26, 5  ;;  %vm935_vm4 = vcmask 1044480  }
  0x1f   : > { %s329_s8 = scalar_lea.vmem %s2392_s0, %s1383_s26  ;;  %s2425_s13 = smov (!%p335_p0, %s1452_s13), 23  ;;  %vm944_vm5 = vcmask 1045504   ;;  %vm953_vm6 = vcmask 1046528  }
  0x20   : > { %v1795_v0 = vld [vmem:[%s329_s8 + $0x10] sm:$0xff]  ;;  %v1797_v1 = vld [vmem:[%s329_s8 + $0x8] sm:$0xff]  ;;  %v1799_v2 = vld [vmem:[%s329_s8 + $0x18] sm:$0xff]  ;;  %s2427_s14 = smov (!%p349_p1, %s346_s14), 23  ;;  %s1385_s12 = sshll.u32 %s2425_s13, 1  ;;  %v974_v50 = vperm.slane %v966_v48, 0 }
  0x21   : > { %411 = vrot.lane.b32.xlu0 %v1795_v0, %s1678_s9  ;;  %402 = vrot.lane.b32.xlu1 %v1797_v1, %s1679_s10  ;;  %v1807_v3 = vld [vmem:[%s329_s8 + $0x20] sm:$0xff]  ;;  %v1823_v5 = vld [vmem:[%s329_s8 + $0x28] sm:$0xff]  ;;  %s1388_s16 = sshll.u32 %s2427_s14, 1  ;;  %s339_s17 = sadd.s32 %s1789_s15, %s1385_s12  ;;  %v976_v52 = vperm.slane %v968_v51, 0 }
  0x22   : > { %471 = vrot.lane.b32.xlu2 %v1799_v2, %s1678_s9  ;;  %v1815_v4 = vld [vmem:[%s329_s8] sm:$0xff]  ;;  %v1825_v6 = vld [vmem:[%s329_s8 + $0x30] sm:$0xff]  ;;  %v1827_v7 = vld [vmem:[%s329_s8 + $0x38] sm:$0xff]  ;;  %s353_s26 = sadd.s32 %s1789_s15, %s1388_s16  ;;  %s1386_s27 = sshll.u32 %s339_s17, 2 }
  0x23   : > { %s1389_s30 = sshll.u32 %s353_s26, 2  ;;  %s341_s29 = scalar_lea.vmem %s2380_s1, %s1386_s27 }
  0x24   : > { %s355_s14 = scalar_lea.vmem %s2381_s2, %s1389_s30  ;;  %v1849_v8 = vld [vmem:[%s341_s29] sm:$0xff]  ;;  %s1439_s12 = sshll.u32 %s1664_s22, 4 }
  0x25   : > { %v1851_v9 = vld [vmem:[%s355_s14] sm:$0xff]  ;;  %s1239_s16 = sadd.s32 %s1660_s21, %s1439_s12  ;;  %s1602_s15 = scalar_lea.hbm %s2384_s5, 256 }
  0x26   : > { %s1440_s21 = sshll.u32 %s1239_s16, 3 }
  0x27   : > { %s1241_s27 = scalar_lea.hbm %s2384_s5, %s1440_s21 }
  0x28   : > { %s1244_s8 = sshll.u32 %s1241_s27, 4  ;;  %s1245_s8 = int_to_ptr.hbm [resolvable:$true] %s1244_s8 }
  0x29   : > { %517 = vrot.lane.b32.xlu0 %v1807_v3, %s1678_s9  ;;  %474 = vrot.lane.b32.xlu1 %v1799_v2, %s1679_s10  ;;  %s1596_s14 = sshra.s32 %s1245_s8, 4  ;;  %s1597_s14 = int_to_ptr.hbm [resolvable:$true] %s1596_s14 }
  0x2a   : > { %399 = vrot.lane.b32.xlu2 %v1797_v1, %s1678_s9  ;;  %s1598_s0 = scalar_lea.hbm %s1597_s14, 64  ;;  %p1603_p6 = scmp.lt.s32.totalorder %s1597_s14, %s2384_s5 }
  0x2b   : > { %p1599_p2 = scmp.ne.s32.totalorder %s1597_s14, %s1598_s0  ;;  %p1604_p7 = scmp.lt.s32.totalorder %s1602_s15, %s1598_s0 }
  0x2d   : > { %p1600_p4 = pnand %p1599_p2, %p1766_p3  ;;  %p1605_p9 = por %p1604_p7, %p1603_p6 }
  0x2f   : > { %p1601_p5 = pneg %p1600_p4 }
  0x31   : > { %414 = vrot.lane.b32.xlu0 %v1795_v0, %s1679_s10  ;;  %390 = vrot.lane.b32.xlu1 %v1815_v4, %s1679_s10  ;;  %p1606_p10 = pnand %p1605_p9, %p1601_p5 }
  0x32   : > { %387 = vrot.lane.b32.xlu2 %v1815_v4, %s1678_s9 }
  0x39   : > { %563 = vrot.lane.b32.xlu0 %v1823_v5, %s1678_s9  ;;  %609 = vrot.lane.b32.xlu1 %v1825_v6, %s1678_s9 }
  0x3a   : > { %655 = vrot.lane.b32.xlu2 %v1827_v7, %s1678_s9 }
  0x41   : > { %520 = vrot.lane.b32.xlu0 %v1807_v3, %s1679_s10  ;;  %566 = vrot.lane.b32.xlu1 %v1823_v5, %s1679_s10 }
  0x42   : > { %612 = vrot.lane.b32.xlu2 %v1825_v6, %s1679_s10 }
  0x49   : > { %701 = vrot.lane.b32.xlu0 %v1849_v8, %s1678_s9  ;;  %747 = vrot.lane.b32.xlu1 %v1851_v9, %s1678_s9  ;;  %s317_s9 = sand.u32 1, %s1652_s19  }
  0x4a   : > { %658 = vrot.lane.b32.xlu2 %v1827_v7, %s1679_s10  ;;  %s1229_s13 = scalar_lea.sflag [#allocation3], %s317_s9 }
  0x51   : > { %704 = vrot.lane.b32.xlu0 %v1849_v8, %s1679_s10  ;;  %750 = vrot.lane.b32.xlu1 %v1851_v9, %s1679_s10  ;;  %s2277_s10 = sshll.u32 %s317_s9, 6 }
  0x52   : > { %980 = vperm.xlu2 %1544, %v971_v43   ;;  %s2307_s22 = scalar_lea.vmem [#allocation2], %s2277_s10 }
  0x53   : > { %s1242_s30 = sshll.u32 %s2307_s22, 4  ;;  %s1243_s30 = int_to_ptr.vmem [resolvable:$true] %s1242_s30 }
  0x59   : > { %988 = vperm.xlu1 %1546, %v973_v33   ;;  %984 = vperm.xlu0 %1545, %v972_v42  }
  0x5a   : > { %992 = vperm.xlu2 %1544, %v974_v50  }
  0x61   : > { %996 = vperm.xlu1 %1546, %v975_v36   ;;  %1004 = vperm.xlu0 %1545, %v977_v49  }
  0x62   : > { %1000 = vperm.xlu2 %1544, %v976_v52  }
  0x69   : > { %1008 = vperm.xlu1 %1546, %v978_v38   ;;  %1548 = vset.pattern.permute.xlu0 %v1681_v44 }
  0x6a   : > { %1024 = vperm.xlu0 %1548, %v972_v42   ;;  %1547 = vset.pattern.permute.xlu2 %v1681_v44 }
  0x6b   : > { %1020 = vperm.xlu2 %1547, %v971_v43  }
  0x71   : > { %1549 = vset.pattern.permute.xlu1 %v1681_v44 }
  0x72   : > { %1028 = vperm.xlu1 %1549, %v973_v33   ;;  %1044 = vperm.xlu0 %1548, %v977_v49  }
  0x73   : > { %1032 = vperm.xlu2 %1547, %v974_v50  }
  0x7a   : > { %1036 = vperm.xlu1 %1549, %v975_v36  }
  0x7b   : > { %1040 = vperm.xlu2 %1547, %v976_v52  }
  0x7c   : > { %v1863_v10 = vpop.permute.xlu2 %471 }
  0x82   : > { %1048 = vperm.xlu1 %1549, %v978_v38  }
  0x84   : > { %v1865_v13 = vpop.permute.xlu2 %399 }
  0x8c   : > { %v388_v18 = vpop.permute.xlu2 %387 }
  0x93   : > { %v412_v11 = vpop.permute.xlu0 %411  ;;  %v403_v12 = vpop.permute.xlu1 %402 }
  0x94   : > { %424 = vmatpush.bf16.msra.mxu0 %v412_v11  ;;  %v1886_v22 = vpop.permute.xlu2 %655 }
  0x98   : > { %425 = vmatpush.bf16.msra.mxu0 %v1795_v0 }
  0x9b   : > { %v1871_v16 = vpop.permute.xlu0 %517  ;;  %v1873_v17 = vpop.permute.xlu1 %474 }
  0x9c   : > { %523 = vmatpush.bf16.msra.mxu1 %v1871_v16  ;;  %426 = vmatpush.bf16.msra.mxu0 %v403_v12  ;;  %v1901_v27 = vpop.permute.xlu2 %612 }
  0x9d   : > { %497 = vmatpush.bf16.msra.mxu3 %v1873_v17 }
  0xa0   : > { %524 = vmatpush.bf16.msra.mxu1 %v1807_v3  ;;  %427 = vmatpush.bf16.msra.mxu0 %v1865_v13 }
  0xa1   : > { %498 = vmatmul.bf16.vlgmr.msra.gmra.mxu3 %v1877_v19 }
  0xa3   : > { %v415_v20 = vpop.permute.xlu0 %414  ;;  %v391_v21 = vpop.permute.xlu1 %390 }
  0xa4   : > { %444 = vmatpush.bf16.msra.mxu2 %v415_v20  ;;  %525 = vmatpush.bf16.msra.mxu1 %v1873_v17  ;;  %v1916_v34 = vpop.permute.xlu2 %658 }
  0xa5   : > { %428 = vmatpush.bf16.msra.mxu0 %v1797_v1 }
  0xa7   : > { %445 = vmatmul.bf16.vlgmr.msra.gmra.mxu2 %v1877_v19 }
  0xa8   : > { %477 = vmatpush.bf16.msrb.mxu2 %v1863_v10  ;;  %526 = vmatpush.bf16.msra.mxu1 %v1863_v10 }
  0xa9   : > { %429 = vmatpush.bf16.msra.mxu0 %v391_v21 }
  0xab   : > { %v1890_v23 = vpop.permute.xlu0 %563  ;;  %v1892_v24 = vpop.permute.xlu1 %609 }
  0xac   : > { %478 = vmatpush.bf16.msrb.mxu2 %v1799_v2  ;;  %527 = vmatpush.bf16.msra.mxu1 %v1799_v2  ;;  %v1993_v51 = vpop.permute.xlu2 %980 }
  0xad   : > { %430 = vmatpush.bf16.msra.mxu0 %v388_v18 }
  0xb0   : > { %479 = vmatpush.bf16.msrb.mxu2 %v415_v20  ;;  %528 = vmatpush.bf16.msra.mxu1 %v415_v20 }
  0xb1   : > { %431 = vmatpush.bf16.msra.mxu0 %v1815_v4 }
  0xb3   : > { %v1906_v30 = vpop.permute.xlu0 %520  ;;  %v567_v31 = vpop.permute.xlu1 %566 }
  0xb4   : > { %480 = vmatpush.bf16.msrb.mxu2 %v412_v11  ;;  %529 = vmatpush.bf16.msra.mxu1 %v412_v11 }
  0xb5   : > { %543 = vmatpush.bf16.msrb.mxu3 %v1906_v30  ;;  %589 = vmatpush.bf16.msrb.mxu0 %v567_v31 }
  0xb6   : > { %432 = vmatmul.bf16.vlgmr.msra.gmra.mxu0 %v1904_v29 }
  0xb8   : > { %481 = vmatpush.bf16.msrb.mxu2 %v1795_v0  ;;  %544 = vmatmul.bf16.vlgmr.msrb.gmra.mxu3 %v1877_v19 }
  0xb9   : > { %569 = vmatpush.bf16.msra.mxu3 %v1890_v23  ;;  %661 = vmatpush.bf16.msra.mxu0 %v1886_v22 }
  0xba   : > { %530 = vmatpush.bf16.msra.mxu1 %v1795_v0 }
  0xbb   : > { %v702_v39 = vpop.permute.xlu0 %701  ;;  %v748_v40 = vpop.permute.xlu1 %747 }
  0xbc   : > { %482 = vmatpush.bf16.msrb.mxu2 %v403_v12 }
  0xbd   : > { %570 = vmatpush.bf16.msra.mxu3 %v1823_v5  ;;  %662 = vmatpush.bf16.msra.mxu0 %v1827_v7 }
  0xbe   : > { %635 = vmatpush.bf16.msrb.mxu1 %v1901_v27 }
  0xbf   : > { %531 = vmatmul.bf16.vlgmr.msra.gmra.mxu1 %v1904_v29 }
  0xc0   : > { %483 = vmatpush.bf16.msrb.mxu2 %v1865_v13 }
  0xc1   : > { %571 = vmatpush.bf16.msra.mxu3 %v1906_v30  ;;  %663 = vmatpush.bf16.msra.mxu0 %v1901_v27 }
  0xc2   : > { %681 = vmatpush.bf16.msra.mxu1 %v1916_v34 }
  0xc3   : > { %v705_v45 = vpop.permute.xlu0 %704  ;;  %v751_v46 = vpop.permute.xlu1 %750 }
  0xc4   : > { %484 = vmatpush.bf16.msrb.mxu2 %v1797_v1 }
  0xc5   : > { %572 = vmatpush.bf16.msra.mxu3 %v1871_v16  ;;  %664 = vmatpush.bf16.msra.mxu0 %v1892_v24 }
  0xc6   : > { %590 = vmatmul.bf16.vlgmr.msrb.gmra.mxu0 %v1877_v19 }
  0xc7   : > { %485 = vmatmul.bf16.vlgmr.msrb.gmra.mxu2 %v1904_v29 }
  0xc8   : > { %615 = vmatpush.bf16.msra.mxu2 %v1892_v24 }
  0xc9   : > { %573 = vmatpush.bf16.msra.mxu3 %v1807_v3  ;;  %665 = vmatpush.bf16.msra.mxu0 %v1825_v6 }
  0xcc   : > { %616 = vmatpush.bf16.msra.mxu2 %v1825_v6 }
  0xcd   : > { %574 = vmatpush.bf16.msra.mxu3 %v1873_v17  ;;  %666 = vmatpush.bf16.msra.mxu0 %v567_v31 }
  0xcf   : > { %636 = vmatmul.bf16.vlgmr.msrb.gmra.mxu1 %v1877_v19 }
  0xd0   : > { %617 = vmatpush.bf16.msra.mxu2 %v567_v31  ;;  %753 = vmatpush.bf16.msrb.mxu1 %v748_v40 }
  0xd1   : > { %575 = vmatpush.bf16.msra.mxu3 %v1863_v10  ;;  %667 = vmatpush.bf16.msra.mxu0 %v1890_v23 }
  0xd4   : > { %618 = vmatpush.bf16.msra.mxu2 %v1890_v23  ;;  %754 = vmatpush.bf16.msrb.mxu1 %v1851_v9 }
  0xd5   : > { %576 = vmatpush.bf16.msra.mxu3 %v1799_v2  ;;  %668 = vmatpush.bf16.msra.mxu0 %v1823_v5 }
  0xd8   : > { %619 = vmatpush.bf16.msra.mxu2 %v1823_v5  ;;  %755 = vmatpush.bf16.msrb.mxu1 %v705_v45 }
  0xd9   : > { %707 = vmatpush.bf16.msrb.mxu3 %v702_v39  ;;  %773 = vmatpush.bf16.msrb.mxu0 %v751_v46 }
  0xda   : > { %577 = vmatmul.bf16.vlgmr.msra.gmra.mxu3 %v1904_v29  ;;  %669 = vmatmul.bf16.vlgmr.msra.gmra.mxu0 %v1904_v29 }
  0xdc   : > { %620 = vmatpush.bf16.msra.mxu2 %v1906_v30  ;;  %756 = vmatpush.bf16.msrb.mxu1 %v702_v39 }
  0xdd   : > { %708 = vmatpush.bf16.msrb.mxu3 %v1849_v8 }
  0xdf   : > { %682 = vmatmul.bf16.vlgmr.msra.gmra.mxu1 %v1877_v19 }
  0xe0   : > { %621 = vmatpush.bf16.msra.mxu2 %v1871_v16  ;;  %757 = vmatpush.bf16.msrb.mxu1 %v1849_v8 }
  0xe1   : > { %709 = vmatpush.bf16.msrb.mxu3 %v1916_v34 }
  0xe4   : > { %622 = vmatpush.bf16.msra.mxu2 %v1807_v3  ;;  %758 = vmatpush.bf16.msrb.mxu1 %v1916_v34 }
  0xe5   : > { %710 = vmatpush.bf16.msrb.mxu3 %v1886_v22 }
  0xe7   : > { %623 = vmatmul.bf16.vlgmr.msra.gmra.mxu2 %v1904_v29 }
  0xe8   : > { %727 = vmatpush.bf16.msrb.mxu2 %v705_v45  ;;  %759 = vmatpush.bf16.msrb.mxu1 %v1886_v22 }
  0xe9   : > { %711 = vmatpush.bf16.msrb.mxu3 %v1827_v7 }
  0xea   : > { %774 = vmatmul.bf16.vlgmr.msrb.gmra.mxu0 %v1877_v19 }
  0xec   : > { %760 = vmatpush.bf16.msrb.mxu1 %v1827_v7 }
  0xed   : > { %712 = vmatpush.bf16.msrb.mxu3 %v1901_v27 }
  0xef   : > { %761 = vmatmul.bf16.vlgmr.msrb.gmra.mxu1 %v1904_v29 }
  0xf1   : > { %713 = vmatpush.bf16.msrb.mxu3 %v1892_v24 }
  0xf5   : > { %714 = vmatpush.bf16.msrb.mxu3 %v1825_v6 }
  0xf7   : > { %728 = vmatmul.bf16.vlgmr.msrb.gmra.mxu2 %v1877_v19 }
  0xf8   : > { %715 = vmatmul.bf16.vlgmr.msrb.gmra.mxu3 %v1904_v29 }
 0x124   : > { %v499_v53 = vpop.f32.mrf.mxu3 }
 0x12a   : > { %v446_v54 = vpop.f32.mrf.mxu2 }
 0x12c   : > { %v501_v55 = vpop.f32.mrf.mxu3 }
 0x132   : > { %v448_v56 = vpop.f32.mrf.mxu2 }
 0x133   : > { %v433_v57 = vpop.f32.mrf.mxu0 }
 0x134   : > { %v1972_v58 = vadd.f32 %v446_v54, %v433_v57 }
 0x136   : > { %v451_v7 = vrot.slane %v1972_v58, 1  ;;  %v452_v8 = vrot.slane %v1972_v58, 2  ;;  %v453_v9 = vrot.slane %v1972_v58, 3  ;;  %v454_v10 = vrot.slane %v1972_v58, 4 }
 0x137   : > { %v455_v11 = vrot.slane %v1972_v58, 5  ;;  %v457_v12 = vrot.slane %v1972_v58, 7  ;;  %v456_v15 = vrot.slane %v1972_v58, 6 }
 0x13b   : > { %v545_v60 = vpop.f32.mrf.mxu3  ;;  %v435_v61 = vpop.f32.mrf.mxu0 }
 0x13c   : > { %v532_v59 = vpop.f32.mrf.mxu1  ;;  %v2013_v61 = vpop.permute.xlu1 %988 }
 0x13d   : > { %v546_v63 = vadd.f32 %v545_v60, %v532_v59 }
 0x13f   : > { %v550_v1 = vrot.slane %v546_v63, 1  ;;  %v551_v2 = vrot.slane %v546_v63, 2  ;;  %v552_v3 = vrot.slane %v546_v63, 3  ;;  %v553_v4 = vrot.slane %v546_v63, 4 }
 0x140   : > { %v554_v5 = vrot.slane %v546_v63, 5  ;;  %v556_v13 = vrot.slane %v546_v63, 7  ;;  %v803_v16 = vperm.slane %v546_v63, 0  ;;  %v555_v24 = vrot.slane %v546_v63, 6 }
 0x141   : > { %v804_v17 = vperm.slane %v550_v1, 0  ;;  %v805_v18 = vperm.slane %v551_v2, 0  ;;  %v806_v21 = vperm.slane %v552_v3, 0  ;;  %v807_v22 = vperm.slane %v553_v4, 0  ;;  %v2018_v2 = vpop.permute.xlu2 %992 }
 0x142   : > { %v808_v23 = vperm.slane %v554_v5, 0  ;;  %v810_v29 = vperm.slane %v556_v13, 0  ;;  %v809_v41 = vperm.slane %v555_v24, 0 }
 0x143   : > { %v547_v0 = vpop.f32.mrf.mxu3  ;;  %v1974_v6 = vpop.f32.mrf.mxu0 }
 0x144   : > { %v534_v62 = vpop.f32.mrf.mxu1  ;;  %v2020_v3 = vpop.permute.xlu1 %996 }
 0x14a   : > { %v486_v14 = vpop.f32.mrf.mxu2 }
 0x14b   : > { %v500_v19 = vadd.f32 %v499_v53, %v486_v14  ;;  %v593_v39 = vpop.f32.mrf.mxu0 }
 0x14c   : > { %v1983_v20 = vpop.f32.mrf.mxu1 }
 0x14d   : > { %v504_v25 = vrot.slane %v500_v19, 1  ;;  %v505_v26 = vrot.slane %v500_v19, 2  ;;  %v506_v27 = vrot.slane %v500_v19, 3  ;;  %v507_v28 = vrot.slane %v500_v19, 4 }
 0x14e   : > { %v508_v30 = vrot.slane %v500_v19, 5  ;;  %v510_v31 = vrot.slane %v500_v19, 7  ;;  %v787_v32 = vperm.slane %v500_v19, 0  ;;  %v509_v40 = vrot.slane %v500_v19, 6 }
 0x14f   : > { %v788_v33 = vperm.slane %v504_v25, 0  ;;  %v789_v34 = vperm.slane %v505_v26, 0  ;;  %v790_v35 = vperm.slane %v506_v27, 0  ;;  %v791_v36 = vperm.slane %v507_v28, 0  ;;  %v2032_v26 = vpop.permute.xlu0 %984 }
 0x150   : > { %v792_v37 = vperm.slane %v508_v30, 0  ;;  %v794_v38 = vperm.slane %v510_v31, 0  ;;  %v900_v42 = vsel %vm899_vm0, %v1972_v58, %v787_v32  ;;  %v793_v47 = vperm.slane %v509_v40, 0 }
 0x151   : > { %v901_v43 = vsel %vm899_vm0, %v451_v7, %v788_v33  ;;  %v902_v44 = vsel %vm899_vm0, %v452_v8, %v789_v34  ;;  %v903_v45 = vsel %vm899_vm0, %v453_v9, %v790_v35  ;;  %v904_v48 = vsel %vm899_vm0, %v454_v10, %v791_v36 }
 0x152   : > { %v488_v46 = vpop.f32.mrf.mxu2  ;;  %v905_v49 = vsel %vm899_vm0, %v455_v11, %v792_v37  ;;  %v907_v50 = vsel %vm899_vm0, %v457_v12, %v794_v38  ;;  %v909_v53 = vsel %vm908_vm1, %v900_v42, %v803_v16  ;;  %v910_v54 = vsel %vm908_vm1, %v901_v43, %v804_v17  ;;  %v2026_v17 = vpop.permute.xlu2 %1000 }
 0x153   : > { %v1998_v55 = vsel %vm908_vm1, %v902_v44, %v805_v18  ;;  %v2001_v56 = vsel %vm908_vm1, %v903_v45, %v806_v21  ;;  %v906_v57 = vsel %vm899_vm0, %v456_v15, %v793_v47  ;;  %v2005_v58 = vsel %vm908_vm1, %v904_v48, %v807_v22 }
 0x154   : > { %v639_v52 = vpop.f32.mrf.mxu1  ;;  %v2008_v59 = vsel %vm908_vm1, %v905_v49, %v808_v23  ;;  %v2011_v60 = vsel %vm908_vm1, %v907_v50, %v810_v29  ;;  %v2016_v62 = vsel %vm908_vm1, %v906_v57, %v809_v41  ;;  %v2035_v29 = vpop.permute.xlu1 %1008 }
 0x157   : > { %v670_v63 = vpop.f32.mrf.mxu0 }
 0x15c   : > { %v683_v1 = vpop.f32.mrf.mxu1 }
 0x15d   : > { %v578_v0 = vpop.f32.mrf.mxu3  ;;  %v2023_v7 = vadd.f32 %v683_v1, %v670_v63 }
 0x15e   : > { %v592_v4 = vadd.f32 %v1974_v6, %v578_v0 }
 0x15f   : > { %v672_v5 = vpop.f32.mrf.mxu0  ;;  %v688_v16 = vrot.slane %v2023_v7, 1  ;;  %v689_v18 = vrot.slane %v2023_v7, 2  ;;  %v690_v6 = vrot.slane %v2023_v7, 3  ;;  %v691_v19 = vrot.slane %v2023_v7, 4 }
 0x160   : > { %v596_v10 = vrot.slane %v592_v4, 1  ;;  %v597_v11 = vrot.slane %v592_v4, 2  ;;  %v598_v12 = vrot.slane %v592_v4, 3  ;;  %v599_v13 = vrot.slane %v592_v4, 4 }
 0x161   : > { %v600_v14 = vrot.slane %v592_v4, 5  ;;  %v602_v15 = vrot.slane %v592_v4, 7  ;;  %v692_v21 = vrot.slane %v2023_v7, 5  ;;  %v819_v23 = vperm.slane %v592_v4, 0 }
 0x162   : > { %v820_v24 = vperm.slane %v596_v10, 0  ;;  %v821_v25 = vperm.slane %v597_v11, 0  ;;  %v694_v27 = vrot.slane %v2023_v7, 7  ;;  %v822_v30 = vperm.slane %v598_v12, 0  ;;  %v2066_v11 = vpop.permute.xlu2 %1020 }
 0x163   : > { %v823_v31 = vperm.slane %v599_v13, 0  ;;  %v601_v33 = vrot.slane %v592_v4, 6  ;;  %v824_v34 = vperm.slane %v600_v14, 0  ;;  %v826_v35 = vperm.slane %v602_v15, 0  ;;  %v2070_v14 = vpop.permute.xlu0 %1004 }
 0x164   : > { %v685_v9 = vpop.f32.mrf.mxu1  ;;  %v851_v36 = vperm.slane %v2023_v7, 0  ;;  %v2039_v37 = vperm.slane %v688_v16, 0  ;;  %v2041_v38 = vperm.slane %v689_v18, 0  ;;  %v2043_v39 = vperm.slane %v690_v6, 0  ;;  %v2076_v6 = vpop.permute.xlu1 %1028 }
 0x165   : > { %v580_v8 = vpop.f32.mrf.mxu3  ;;  %v2045_v40 = vperm.slane %v691_v19, 0  ;;  %v2047_v41 = vperm.slane %v692_v21, 0  ;;  %v2049_v43 = vperm.slane %v694_v27, 0  ;;  %v918_v44 = vsel %vm917_vm2, %v909_v53, %v819_v23 }
 0x166   : > { %v919_v45 = vsel %vm917_vm2, %v910_v54, %v820_v24  ;;  %v825_v49 = vperm.slane %v601_v33, 0  ;;  %v920_v52 = vsel %vm917_vm2, %v1998_v55, %v821_v25  ;;  %v921_v57 = vsel %vm917_vm2, %v2001_v56, %v822_v30 }
 0x167   : > { %v775_v28 = vpop.f32.mrf.mxu0  ;;  %v922_v63 = vsel %vm917_vm2, %v2005_v58, %v823_v31  ;;  %v923_v10 = vsel %vm917_vm2, %v2008_v59, %v824_v34  ;;  %v925_v55 = vsel %vm917_vm2, %v2011_v60, %v826_v35 }
 0x168   : > { %v924_v58 = vsel %vm917_vm2, %v2016_v62, %v825_v49 }
 0x16a   : > { %v624_v22 = vpop.f32.mrf.mxu2 }
 0x16b   : > { %v638_v32 = vadd.f32 %v1983_v20, %v624_v22  ;;  %v693_v20 = vrot.slane %v2023_v7, 6 }
 0x16c   : > { %v762_v42 = vpop.f32.mrf.mxu1 }
 0x16d   : > { %v642_v46 = vrot.slane %v638_v32, 1  ;;  %v643_v47 = vrot.slane %v638_v32, 2  ;;  %v644_v48 = vrot.slane %v638_v32, 3  ;;  %v2054_v50 = vadd.f32 %v775_v28, %v762_v42 }
 0x16e   : > { %v645_v0 = vrot.slane %v638_v32, 4  ;;  %v646_v53 = vrot.slane %v638_v32, 5  ;;  %v648_v1 = vrot.slane %v638_v32, 7  ;;  %v647_v4 = vrot.slane %v638_v32, 6 }
 0x16f   : > { %v835_v5 = vperm.slane %v638_v32, 0  ;;  %v777_v8 = vpop.f32.mrf.mxu0  ;;  %v857_v9 = vperm.slane %v693_v20, 0  ;;  %v836_v56 = vperm.slane %v642_v46, 0  ;;  %v837_v12 = vperm.slane %v643_v47, 0 }
 0x170   : > { %v838_v13 = vperm.slane %v644_v48, 0  ;;  %v780_v15 = vrot.slane %v2054_v50, 1  ;;  %v781_v16 = vrot.slane %v2054_v50, 2  ;;  %v782_v18 = vrot.slane %v2054_v50, 3 }
 0x171   : > { %v783_v59 = vrot.slane %v2054_v50, 4  ;;  %v839_v60 = vperm.slane %v645_v0, 0  ;;  %v840_v19 = vperm.slane %v646_v53, 0  ;;  %v842_v21 = vperm.slane %v648_v1, 0 }
 0x172   : > { %v626_v54 = vpop.f32.mrf.mxu2  ;;  %v841_v23 = vperm.slane %v647_v4, 0  ;;  %v784_v62 = vrot.slane %v2054_v50, 5  ;;  %v786_v24 = vrot.slane %v2054_v50, 7  ;;  %v785_v25 = vrot.slane %v2054_v50, 6 }
 0x173   : > { %v927_v27 = vsel %vm926_vm3, %v918_v44, %v835_v5  ;;  %v883_v28 = vperm.slane %v2054_v50, 0  ;;  %v928_v30 = vsel %vm926_vm3, %v919_v45, %v836_v56  ;;  %v929_v31 = vsel %vm926_vm3, %v920_v52, %v837_v12  ;;  %v1033_v5 = vpop.permute.xlu2 %1032 }
 0x174   : > { %v764_v22 = vpop.f32.mrf.mxu1  ;;  %v930_v32 = vsel %vm926_vm3, %v921_v57, %v838_v13  ;;  %v884_v33 = vperm.slane %v780_v15, 0  ;;  %v885_v34 = vperm.slane %v781_v16, 0  ;;  %v886_v35 = vperm.slane %v782_v18, 0 }
 0x175   : > { %v887_v42 = vperm.slane %v783_v59, 0  ;;  %v931_v46 = vsel %vm926_vm3, %v922_v63, %v839_v60  ;;  %v932_v47 = vsel %vm926_vm3, %v923_v10, %v840_v19  ;;  %v933_v44 = vsel %vm926_vm3, %v924_v58, %v841_v23  ;;  %v1037_v58 = vpop.permute.xlu1 %1036 }
 0x176   : > { %v934_v48 = vsel %vm926_vm3, %v925_v55, %v842_v21  ;;  %v888_v49 = vperm.slane %v784_v62, 0  ;;  %v890_v50 = vperm.slane %v786_v24, 0  ;;  %v889_v0 = vperm.slane %v785_v25, 0 }
 0x177   : > { %v936_v52 = vsel %vm935_vm4, %v927_v27, %v851_v36  ;;  %v937_v53 = vsel %vm935_vm4, %v928_v30, %v2039_v37  ;;  %v938_v63 = vsel %vm935_vm4, %v929_v31, %v2041_v38  ;;  %v939_v1 = vsel %vm935_vm4, %v930_v32, %v2043_v39  ;;  %v1025_v38 = vpop.permute.xlu0 %1024 }
 0x178   : > { %v940_v54 = vsel %vm935_vm4, %v931_v46, %v2045_v40  ;;  %v941_v4 = vsel %vm935_vm4, %v932_v47, %v2047_v41  ;;  %v942_v7 = vsel %vm935_vm4, %v933_v44, %v857_v9  ;;  %v943_v36 = vsel %vm935_vm4, %v934_v48, %v2049_v43 }
 0x17a   : > { %v729_v20 = vpop.f32.mrf.mxu2 }
 0x17b   : > { %v716_v45 = vpop.f32.mrf.mxu3 }
 0x17c   : > { %v730_v57 = vadd.f32 %v729_v20, %v716_v45 }
 0x17e   : > { %v734_v8 = vrot.slane %v730_v57, 1  ;;  %v735_v37 = vrot.slane %v730_v57, 2  ;;  %v736_v10 = vrot.slane %v730_v57, 3  ;;  %v737_v55 = vrot.slane %v730_v57, 4 }
 0x17f   : > { %v738_v56 = vrot.slane %v730_v57, 5  ;;  %v740_v12 = vrot.slane %v730_v57, 7  ;;  %v867_v39 = vperm.slane %v730_v57, 0  ;;  %v739_v13 = vrot.slane %v730_v57, 6 }
 0x180   : > { %v868_v40 = vperm.slane %v734_v8, 0  ;;  %v869_v15 = vperm.slane %v735_v37, 0  ;;  %v870_v16 = vperm.slane %v736_v10, 0  ;;  %v871_v41 = vperm.slane %v737_v55, 0 }
 0x181   : > { %v872_v18 = vperm.slane %v738_v56, 0  ;;  %v874_v9 = vperm.slane %v740_v12, 0  ;;  %v873_v59 = vperm.slane %v739_v13, 0  ;;  %v945_v43 = vsel %vm944_vm5, %v936_v52, %v867_v39 }
 0x182   : > { %v946_v60 = vsel %vm944_vm5, %v937_v53, %v868_v40  ;;  %v947_v19 = vsel %vm944_vm5, %v938_v63, %v869_v15  ;;  %v948_v21 = vsel %vm944_vm5, %v939_v1, %v870_v16  ;;  %v949_v22 = vsel %vm944_vm5, %v940_v54, %v871_v41  ;;  %v731_v23 = vpop.f32.mrf.mxu2 }
 0x183   : > { %v950_v62 = vsel %vm944_vm5, %v941_v4, %v872_v18  ;;  %v951_v24 = vsel %vm944_vm5, %v942_v7, %v873_v59  ;;  %v952_v25 = vsel %vm944_vm5, %v943_v36, %v874_v9  ;;  %v954_v27 = vsel %vm953_vm6, %v945_v43, %v883_v28  ;;  %v718_v30 = vpop.f32.mrf.mxu3 }
 0x184   : > { %v955_v31 = vsel %vm953_vm6, %v946_v60, %v884_v33  ;;  %v956_v32 = vsel %vm953_vm6, %v947_v19, %v885_v34  ;;  %v957_v20 = vsel %vm953_vm6, %v948_v21, %v886_v35  ;;  %v958_v46 = vsel %vm953_vm6, %v949_v22, %v887_v42 }
 0x185   : > { %v959_v47 = vsel %vm953_vm6, %v950_v62, %v888_v49  ;;  %v960_v44 = vsel %vm953_vm6, %v951_v24, %v889_v0  ;;  %v961_v48 = vsel %vm953_vm6, %v952_v25, %v890_v50  ;;  %v1011_v45 = vmul.f32 %v1993_v51, %v954_v27  ;;  %v1041_v50 = vpop.permute.xlu2 %1040 }
 0x186   : > { %v1012_v52 = vmul.f32 %v2032_v26, %v955_v31  ;;  %v1013_v28 = vmul.f32 %v2013_v61, %v956_v32  ;;  %v1014_v33 = vmul.f32 %v2018_v2, %v957_v20  ;;  %v1015_v34 = vmul.f32 %v2020_v3, %v958_v46  ;;  %v1045_v3 = vpop.permute.xlu0 %1044 }
 0x187   : > { %v1016_v35 = vmul.f32 %v2026_v17, %v959_v47  ;;  %v1017_v42 = vmul.f32 %v2070_v14, %v960_v44  ;;  %v1018_v49 = vmul.f32 %v2035_v29, %v961_v48  ;;  %v2131_v0 = vadd.f32 %v2066_v11, %v1011_v45  ;;  %v1049_v14 = vpop.permute.xlu1 %1048 }
 0x188   : > { %v2133_v57 = vadd.f32 %v1025_v38, %v1012_v52  ;;  %v2136_v51 = vadd.f32 %v2076_v6, %v1013_v28  ;;  %v2138_v61 = vadd.f32 %v1033_v5, %v1014_v33  ;;  %v2140_v2 = vadd.f32 %v1037_v58, %v1015_v34 }
 0x189   : > { %v2142_v26 = vadd.f32 %v1041_v50, %v1016_v35  ;;  %v1430_v17 = vmul.f32 -1.442695, %v2131_v0  ;;  %v2145_v29 = vadd.f32 %v1045_v3, %v1017_v42  ;;  %v2150_v6 = vadd.f32 %v1049_v14, %v1018_v49 }
 0x18a   : > { %v1431_v11 = vmul.f32 -1.442695, %v2133_v57  ;;  %v1432_v53 = vmul.f32 -1.442695, %v2136_v51  ;;  %v1433_v63 = vmul.f32 -1.442695, %v2138_v61 }
 0x18b   : > { %1550 = vpow2.f32 %v1430_v17  ;;  %v1434_v1 = vmul.f32 -1.442695, %v2140_v2  ;;  %v1435_v54 = vmul.f32 -1.442695, %v2142_v26  ;;  %v1436_v4 = vmul.f32 -1.442695, %v2145_v29 }
 0x18c   : > { %1552 = vpow2.f32 %v1431_v11  ;;  %v1437_v7 = vmul.f32 -1.442695, %v2150_v6 }
 0x18d   : > { %1554 = vpow2.f32 %v1432_v53 }
 0x18e   : > { %1556 = vpow2.f32 %v1433_v63 }
 0x18f   : > { %1558 = vpow2.f32 %v1434_v1 }
 0x190   : > { %1560 = vpow2.f32 %v1435_v54 }
 0x191   : > { %v1551_v36 = vpop.eup %1550  ;;  %1562 = vpow2.f32 %v1436_v4 }
 0x192   : > { %v1553_v5 = vpop.eup %1552  ;;  %v2156_v8 = vadd.f32 1.0, %v1551_v36  ;;  %1564 = vpow2.f32 %v1437_v7 }
 0x193   : > { %v1555_v37 = vpop.eup %1554  ;;  %v2158_v10 = vadd.f32 1.0, %v1553_v5 }
 0x194   : > { %v1557_v55 = vpop.eup %1556  ;;  %v2160_v38 = vadd.f32 1.0, %v1555_v37  ;;  %1566 = vrcp.f32 %v2156_v8  ;;  %v1102_v58 = vand.u32 2147483648, %v2156_v8  ;;  %vm1096_vm7 = vweird.f32 %v2156_v8 }
 0x195   : > { %v1559_v56 = vpop.eup %1558  ;;  %v2163_v12 = vadd.f32 1.0, %v1557_v55  ;;  %1568 = vrcp.f32 %v2158_v10  ;;  %v1117_v15 = vand.u32 2147483648, %v2158_v10  ;;  %v1100_v9 = vand.u32 2147483647, %v2156_v8 }
 0x196   : > { %v1561_v39 = vpop.eup %1560  ;;  %v2166_v13 = vadd.f32 1.0, %v1559_v56  ;;  %1570 = vrcp.f32 %v2160_v38  ;;  %v2183_v60 = vor.u32 1.1754944e-38, %v1102_v58  ;;  %vm1111_vm8 = vweird.f32 %v2158_v10 }
 0x197   : > { %v1563_v40 = vpop.eup %1562  ;;  %v2171_v41 = vadd.f32 1.0, %v1561_v39  ;;  %1572 = vrcp.f32 %v2163_v12  ;;  %v1115_v19 = vand.u32 2147483647, %v2158_v10  ;;  %v1132_v21 = vand.u32 2147483648, %v2160_v38 }
 0x198   : > { %v1565_v16 = vpop.eup %1564  ;;  %1574 = vrcp.f32 %v2166_v13  ;;  %v2188_v22 = vadd.f32 1.0, %v1563_v40  ;;  %v1118_v62 = vor.u32 1.1754944e-38, %v1117_v15  ;;  %vm1126_vm9 = vweird.f32 %v2160_v38 }
 0x199   : > { %v1130_v24 = vand.u32 2147483647, %v2160_v38  ;;  %v2196_v27 = vadd.f32 1.0, %v1565_v16  ;;  %v1145_v31 = vand.u32 2147483647, %v2163_v12  ;;  %1576 = vrcp.f32 %v2171_v41 }
 0x19a   : > { %v2174_v18 = vpop.eup %1566  ;;  %vm2201_vm11 = vcmp.eq.f32.partialorder %v1100_v9, 8.507059e+37  ;;  %vm1141_vm12 = vweird.f32 %v2163_v12  ;;  %v1147_v47 = vand.u32 2147483648, %v2163_v12  ;;  %vm2210_vm13 = vcmp.eq.f32.partialorder %v1115_v19, 8.507059e+37 }
 0x19b   : > { %v2179_v59 = vpop.eup %1568  ;;  %v1092_v43 = vmul.f32 %v2174_v18, %v2156_v8  ;;  %vm1097_vm10 = vweird.f32 %v2174_v18  ;;  %v1133_v52 = vor.u32 1.1754944e-38, %v1132_v21  ;;  %vm1156_vm14 = vweird.f32 %v2166_v13 }
 0x19c   : > { %v1107_v23 = vmul.f32 %v2179_v59, %v2158_v10  ;;  %v2194_v25 = vpop.eup %1570  ;;  %v1160_v28 = vand.u32 2147483647, %v2166_v13  ;;  %vm1112_vm15 = vweird.f32 %v2179_v59  ;;  %vm2218_vm0 = vcmp.eq.f32.partialorder %v1130_v24, 8.507059e+37  ;;  %vm2237_vm3 = vmor %vm1096_vm7, %vm1097_vm10 }
 0x19d   : > { %v1093_v30 = vsub.f32 1.0, %v1092_v43  ;;  %v1122_v46 = vmul.f32 %v2194_v25, %v2160_v38  ;;  %v1573_v44 = vpop.eup %1572  ;;  %vm2224_vm1 = vcmp.eq.f32.partialorder %v1145_v31, 8.507059e+37  ;;  %v1162_v14 = vand.u32 2147483648, %v2166_v13  ;;  %vm2254_vm5 = vmor %vm1111_vm8, %vm1112_vm15 }
 0x19e   : > { %v1108_v20 = vsub.f32 1.0, %v1107_v23  ;;  %v1575_v33 = vpop.eup %1574  ;;  %v1137_v49 = vmul.f32 %v1573_v44, %v2163_v12  ;;  %vm1127_vm2 = vweird.f32 %v2194_v25  ;;  %v1148_v4 = vor.u32 1.1754944e-38, %v1147_v47 }
 0x19f   : > { %v1094_v48 = vmul.f32 %v2174_v18, %v1093_v30  ;;  %v1123_v35 = vsub.f32 1.0, %v1122_v46  ;;  %v1152_v17 = vmul.f32 %v1575_v33, %v2166_v13  ;;  %v1577_v1 = vpop.eup %1576  ;;  %vm2241_vm4 = vcmp.eq.f32.partialorder %v1160_v28, 8.507059e+37  ;;  %vm2266_vm7 = vmor %vm1126_vm9, %vm1127_vm2 }
 0x1a0   : > { %v1109_v34 = vmul.f32 %v2179_v59, %v1108_v20  ;;  %v1138_v63 = vsub.f32 1.0, %v1137_v49  ;;  %1578 = vrcp.f32 %v2188_v22  ;;  %vm1142_vm6 = vweird.f32 %v1573_v44 }
 0x1a1   : > { %v1095_v50 = vadd.f32 %v2174_v18, %v1094_v48  ;;  %v1124_v53 = vmul.f32 %v2194_v25, %v1123_v35  ;;  %v1153_v7 = vsub.f32 1.0, %v1152_v17  ;;  %vm1157_vm8 = vweird.f32 %v1575_v33  ;;  %vm1143_vm9 = vmor %vm1141_vm12, %vm1142_vm6 }
 0x1a2   : > { %v1110_v11 = vadd.f32 %v2179_v59, %v1109_v34  ;;  %v1139_v55 = vmul.f32 %v1573_v44, %v1138_v63  ;;  %v1167_v58 = vmul.f32 %v1577_v1, %v2171_v41  ;;  %v1163_v16 = vor.u32 1.1754944e-38, %v1162_v14  ;;  %vm1158_vm10 = vmor %vm1156_vm14, %vm1157_vm8 }
 0x1a3   : > { %v1099_v5 = vsel %vm2237_vm3, %v2174_v18, %v1095_v50  ;;  %v1125_v37 = vadd.f32 %v2194_v25, %v1124_v53  ;;  %v1154_v10 = vmul.f32 %v1575_v33, %v1153_v7  ;;  %v1175_v18 = vand.u32 2147483647, %v2171_v41 }
 0x1a4   : > { %v1114_v56 = vsel %vm2254_vm5, %v2179_v59, %v1110_v11  ;;  %v1140_v15 = vadd.f32 %v1573_v44, %v1139_v55  ;;  %v1104_v38 = vsel %vm2201_vm11, %v2183_v60, %v1099_v5  ;;  %v1168_v59 = vsub.f32 1.0, %v1167_v58 }
 0x1a5   : > { %v1129_v40 = vsel %vm2266_vm7, %v2194_v25, %v1125_v37  ;;  %v1155_v9 = vadd.f32 %v1575_v33, %v1154_v10  ;;  %v1177_v43 = vand.u32 2147483648, %v2171_v41  ;;  %v1119_v19 = vsel %vm2210_vm13, %v1118_v62, %v1114_v56 }
 0x1a6   : > { %v1144_v21 = vsel %vm1143_vm9, %v1573_v44, %v1140_v15  ;;  %vm1172_vm15 = vweird.f32 %v1577_v1  ;;  %1580 = vrcp.f32 %v2196_v27  ;;  %v1579_v23 = vpop.eup %1578  ;;  %v1134_v12 = vsel %vm2218_vm0, %v1133_v52, %v1129_v40 }
 0x1a7   : > { %v1149_v60 = vsel %vm2224_vm1, %v1148_v4, %v1144_v21  ;;  %v1159_v24 = vsel %vm1158_vm10, %v1575_v33, %v1155_v9  ;;  %v1169_v25 = vmul.f32 %v1577_v1, %v1168_v59  ;;  %vm1219_vm11 = vcmask 130048  }
 0x1a8   : > { %v1164_v62 = vsel %vm2241_vm4, %v1163_v16, %v1159_v24  ;;  %v1182_v13 = vmul.f32 %v1579_v23, %v2188_v22  ;;  %vm1171_vm12 = vweird.f32 %v2171_v41  ;;  %v1211_v31 = vmul.f32 %v1104_v38, %v2131_v0 }
 0x1a9   : > { %v1170_v30 = vadd.f32 %v1577_v1, %v1169_v25  ;;  %v1212_v32 = vmul.f32 %v1119_v19, %v2133_v57  ;;  %vm1173_vm13 = vmor %vm1171_vm12, %vm1172_vm15  ;;  %v1178_v20 = vor.u32 1.1754944e-38, %v1177_v43  ;;  %v1213_v47 = vmul.f32 %v1134_v12, %v2136_v51 }
 0x1aa   : > { %v1183_v46 = vsub.f32 1.0, %v1182_v13  ;;  %v1214_v44 = vmul.f32 %v1149_v60, %v2138_v61  ;;  %vm1176_vm14 = vcmp.eq.f32.partialorder %v1175_v18, 8.507059e+37  ;;  %v1192_v45 = vand.u32 2147483648, %v2188_v22  ;;  %1220 = vst.msk [vmem:[%s2307_s22] sm:$0xff] %vm1219_vm11, %v1211_v31 }
 0x1ab   : > { %v1174_v48 = vsel %vm1173_vm13, %v1577_v1, %v1170_v30  ;;  %v1215_v52 = vmul.f32 %v1164_v62, %v2140_v2  ;;  %vm1187_vm0 = vweird.f32 %v1579_v23  ;;  %v1190_v61 = vand.u32 2147483647, %v2188_v22  ;;  %1221 = vst.msk [vmem:[%s2307_s22 + $0x8] sm:$0xff] %vm1219_vm11, %v1212_v32 }
 0x1ac   : > { %v1581_v0 = vpop.eup %1580  ;;  %v1179_v57 = vsel %vm1176_vm14, %v1178_v20, %v1174_v48  ;;  %v1184_v51 = vmul.f32 %v1579_v23, %v1183_v46  ;;  %1222 = vst.msk [vmem:[%s2307_s22 + $0x10] sm:$0xff] %vm1219_vm11, %v1213_v47  ;;  %vm1186_vm1 = vweird.f32 %v2188_v22  ;;  %v1193_v33 = vor.u32 1.1754944e-38, %v1192_v45 }
 0x1ad   : > { %v1197_v2 = vmul.f32 %v1581_v0, %v2196_v27  ;;  %v1216_v41 = vmul.f32 %v1179_v57, %v2142_v26  ;;  %1223 = vst.msk [vmem:[%s2307_s22 + $0x18] sm:$0xff] %vm1219_vm11, %v1214_v44  ;;  %vm1188_vm2 = vmor %vm1186_vm1, %vm1187_vm0  ;;  %vm1191_vm3 = vcmp.eq.f32.partialorder %v1190_v61, 8.507059e+37  ;;  %v1207_v42 = vand.u32 2147483648, %v2196_v27 }
 0x1ae   : > { %v1185_v28 = vadd.f32 %v1579_v23, %v1184_v51  ;;  %1224 = vst.msk [vmem:[%s2307_s22 + $0x20] sm:$0xff] %vm1219_vm11, %v1215_v52  ;;  %vm1202_vm4 = vweird.f32 %v1581_v0  ;;  %v1205_v22 = vand.u32 2147483647, %v2196_v27  ;;  %vm1201_vm5 = vweird.f32 %v2196_v27 }
 0x1af   : > { %v1198_v34 = vsub.f32 1.0, %v1197_v2  ;;  %1225 = vst.msk [vmem:[%s2307_s22 + $0x28] sm:$0xff] %vm1219_vm11, %v1216_v41  ;;  %vm1203_vm6 = vmor %vm1201_vm5, %vm1202_vm4  ;;  %v1208_v17 = vor.u32 1.1754944e-38, %v1207_v42 }
 0x1b0   : > { %v1189_v35 = vsel %vm1188_vm2, %v1579_v23, %v1185_v28  ;;  %vm1206_vm7 = vcmp.eq.f32.partialorder %v1205_v22, 8.507059e+37 }
 0x1b1   : > { %v1194_v26 = vsel %vm1191_vm3, %v1193_v33, %v1189_v35  ;;  %v1199_v49 = vmul.f32 %v1581_v0, %v1198_v34 }
 0x1b2   : > { %v1217_v50 = vmul.f32 %v1194_v26, %v2145_v29 }
 0x1b3   : > { %v1200_v3 = vadd.f32 %v1581_v0, %v1199_v49 }
 0x1b4   : > { %1226 = vst.msk [vmem:[%s2307_s22 + $0x30] sm:$0xff] %vm1219_vm11, %v1217_v50 }
 0x1b5   : > { %v1204_v14 = vsel %vm1203_vm6, %v1581_v0, %v1200_v3 }
 0x1b6   : > { %v1209_v11 = vsel %vm1206_vm7, %v1208_v17, %v1204_v14 }
 0x1b7   : > { %v1218_v53 = vmul.f32 %v1209_v11, %v2150_v6 }
 0x1b9   : > { %1227 = vst.msk [vmem:[%s2307_s22 + $0x38] sm:$0xff] %vm1219_vm11, %v1218_v53 }
 0x1ba   : > { %1609 = shalt.err (!%p1606_p10)
}
 0x1bb   : > { %s1682_s9 = smov 128   ;;  %s1683_s22 = smov 256  }
 0x1bc   : > { %s1684_s16 = smov 8  }
 0x1bd   : > { %1466 = dma.vmem_to_hbm [thread:$0]  (%p1766_p3), %s1243_s30, 1024, %s1245_s8, %s1229_s13, %s1682_s9, %s1683_s22, %s1684_s16  }
 0x1be PF: > { %p1472_p11 = scmp.ge.s32.totalorder %s1676_s25, 2  ;;  %s1259_s21 = sand.u32 1, %s1648_s18  }
 0x1bf   : > { %s1260_s17 = scalar_lea.sflag [#allocation3], %s1259_s21 }
 0x1c0   : > { %p1469_p12 = pnand %p1472_p11, %p1775_p8 }
 0x1c2   : > { %p1470_p13 = pneg %p1469_p12 }
 0x1c4   : > { %1643 = dma.done.wait (%p1470_p13), %s1260_s17, 1024  }
 0x1c5   : > { %1645 = vsyncadd (%p1470_p13), %s1260_s17, 4294966272  ;;  %s18_s25 = sadd.s32 1, %s1676_s25   ;;  %s2409_s6 = sld [smem:[#allocation5_spill]] }
 0x1c6   : > { %p15_p0 = scmp.ge.s32.totalorder %s18_s25, 6   ;;  %s2410_s26 = sld [smem:[#allocation6_spill]] }
 0x1c7   : > { %s2411_s18 = smov %s1652_s19  ;;  %s2412_s19 = smov %s1656_s20 }
 0x1c8   : > { %s2413_s20 = smov %s1784_s11  ;;  %s2414_s21 = smov %s1668_s23 }
 0x1c9   : > { %s2415_s22 = smov %s1672_s24  ;;  %17 = sbr.rel (!%p15_p0) target bundleno = 7 (0x7), region = 81 }
 0x1cb   : > { %s2416_s23 = smov %s2409_s6 }
 0x1cc   : > { %s2417_s24 = smov %s2410_s26 }
 0x1ce   :  { %1266 = vsyncpa [#allocation3], 1 }
 0x1cf   :  { %1268 = vsyncpa [#allocation3 + $0x1], 1 }

</bundles_post_ra>
